<compile_context>
chip_gen: v7x
topology: tpu7x:2x2x1
jax: 0.10.0
libtpu: 0.0.40
codegen_flags: <defaults>
</compile_context>

<pallas_src>
import functools
import math

import numpy as np

import jax
import jax.numpy as jnp
from jax.experimental import pallas as pl
from jax.experimental.pallas import tpu as pltpu

NEG_SLOPE = 0.2  # LeakyReLU slope assumed for the Classifier conv blocks


# --------------------------------------------------------------------------- constant taps
def _row_select(h, ho):
    """S (3*ho, h): S[kh*ho + i, r] = 1  iff  r == 2*i + kh - 1 (zero padding implicit)."""
    S = np.zeros((3 * ho, h), np.float32)
    for kh in range(3):
        for i in range(ho):
            r = 2 * i + kh - 1
            if 0 <= r < h:
                S[kh * ho + i, r] = 1.0
    return S


def _col_taps(w, wo):
    """Tap (3, w, wo): Tap[kw, c, j] = 1  iff  c == 2*j + kw - 1 (zero padding implicit)."""
    T = np.zeros((3, w, wo), np.float32)
    for kw in range(3):
        for j in range(wo):
            c = 2 * j + kw - 1
            if 0 <= c < w:
                T[kw, c, j] = 1.0
    return T


# --------------------------------------------------------------------------------- kernel
def _fused_affine_kernel(*refs, hos, batch, n_layers, neg_slope):
    """Entire AffineGenerator forward in one invocation (no grid).

    refs layout (inputs..., output):
      refs[0]         act0 : (H0, B*Cin0*W0)          VMEM  lane-concatenated input
      refs[1+3l+0]    S_l  : (3*Ho, H)                VMEM  constant 0/1 row-tap gather
      refs[1+3l+1]    M_l  : (3, B*Cin*W, B*Cout*Wo)  VMEM  kw/channel/batch-folded weights
      refs[1+3l+2]    b_l  : (1, B*Cout*Wo)           VMEM  lane-broadcast bias row
      refs[1+3L+0]    lwB  : (B*Clast, B*9)           VMEM  block-diag linear weight
      refs[1+3L+1]    lbB  : (1, B*9)                 VMEM  tiled linear bias
      refs[-1]        out  : (1, B*9)                 VMEM  row-major 3x3 per batch block
    """
    lw_ref = refs[1 + 3 * n_layers]
    lb_ref = refs[2 + 3 * n_layers]
    out_ref = refs[3 + 3 * n_layers]

    act = refs[0][...]                               # (H, B*C*W), lives in vregs/VMEM
    # ---- conv stack: 3x3 / stride 2 / pad 1 + LeakyReLU, 4 matmuls per layer ------------
    for l in range(n_layers):
        ho = hos[l]
        S = refs[1 + 3 * l][...]                     # (3*Ho, H)
        m_ref = refs[2 + 3 * l]                      # (3, B*Cin*W, B*Cout*Wo)
        brow = refs[3 + 3 * l][...]                  # (1, B*Cout*Wo)

        U = jnp.dot(S, act, preferred_element_type=jnp.float32)   # (3*Ho, B*Cin*W)
        y = None
        for kh in range(3):                          # row-block slices of U (sublane only)
            part = jnp.dot(U[kh * ho:(kh + 1) * ho, :], m_ref[kh],
                           preferred_element_type=jnp.float32)    # (Ho, B*Cout*Wo)
            y = part if y is None else y + part
        y = y + brow                                 # bias folded as a lane-broadcast row
        act = jnp.maximum(y, neg_slope * y)          # LeakyReLU as a single max

    # ---- flatten (spatial is 1x1) + Linear(Clast -> 9), batch kept on lanes -------------
    logits = jnp.dot(act, lw_ref[...], preferred_element_type=jnp.float32) + lb_ref[...]
    # logits: (1, B*9); lane b*9 + k holds logit k of batch item b

    # ---- kornia.get_affine_matrix2d(tanh(x0), center=x[:,5:7], scale=x[:,2:4], angle=x[:,4])
    def sc(b, k):                                    # (1,1) scalar-ish static lane slice
        return logits[0:1, b * 9 + k:b * 9 + k + 1]

    trans = [jnp.tanh(sc(b, 0)) for b in range(batch)]
    col_idx = jax.lax.broadcasted_iota(jnp.int32, (1, batch * 9), 1)
    entries = jnp.zeros((1, batch * 9), jnp.float32)
    for b in range(batch):
        sx, sy = sc(b, 2), sc(b, 3)
        ang, cx, cy = sc(b, 4), sc(b, 5), sc(b, 6)
        rad = ang * (math.pi / 180.0)
        c_, s_ = jnp.cos(rad), jnp.sin(rad)
        # get_rotation_matrix2d(center, -angle, scale): R(-a) @ diag(sx, sy)
        m00, m01 = c_ * sx, -s_ * sy
        m10, m11 = s_ * sx, c_ * sy
        tx = cx - (m00 * cx + m01 * cy)
        ty = cy - (m10 * cx + m11 * cy)
        # torch: transform[..., 2] += translations  ((B,) vs (B,2); valid only for B in {1,2})
        tx = tx + trans[0]
        ty = ty + trans[batch - 1]
        for k, v in enumerate((m00, m01, tx, m10, m11, ty)):
            entries = entries + jnp.where(col_idx == b * 9 + k, v, 0.0)
        entries = entries + jnp.where(col_idx == b * 9 + 8, 1.0, 0.0)   # bottom-right 1
    out_ref[...] = entries.astype(out_ref.dtype)     # one lane-masked store


# -------------------------------------------------------------------------------- wrapper
def init_params(key, in_ch=2, nb_features=(2, 2, 2, 2, 2), n_classes=9, inshape=(32, 32)):
    convs = []
    cin = in_ch
    for cout in nb_features:
        key, kw_, kb_ = jax.random.split(key, 3)
        w = 0.1 * jax.random.normal(kw_, (3, 3, cin, cout), jnp.float32)   # HWIO
        b = 0.1 * jax.random.normal(kb_, (cout,), jnp.float32)
        convs.append((w, b))
        cin = cout
    h, w_ = inshape
    for _ in nb_features:
        h = (h - 1) // 2 + 1
        w_ = (w_ - 1) // 2 + 1
    feat_dim = cin * h * w_
    key, k1, k2 = jax.random.split(key, 3)
    lw = 0.1 * jax.random.normal(k1, (feat_dim, n_classes), jnp.float32)
    lb = 0.1 * jax.random.normal(k2, (n_classes,), jnp.float32)
    # present in the module but unused in forward (kept for shape fidelity)
    max_angle = 30.0 * jnp.ones((1,), jnp.float32)
    max_scale = 0.01 * jnp.ones((1,), jnp.float32)
    return convs, (lw, lb), (max_angle, max_scale)


def affine_generator_forward(params, x1_nchw, x2_nchw):
    convs, (lw, lb), _ = params
    B, _, H, W = x1_nchw.shape
    assert B in (1, 2), "original torch translation broadcast only supports batch 1 or 2"

    x = jnp.concatenate([x1_nchw, x2_nchw], axis=1).astype(jnp.float32)   # (B, Cin0, H, W)
    cin0 = x.shape[1]
    # lane-concatenated layout: act0[r, b*C*W + ci*W + c] = x[b, ci, r, c]
    act0 = jnp.transpose(x, (2, 0, 1, 3)).reshape(H, B * cin0 * W)        # (32, 128)

    vmem = pl.BlockSpec(memory_space=pltpu.MemorySpace.VMEM)
    eye_b = jnp.eye(B, dtype=jnp.float32)

    args, in_specs, hos = [act0], [vmem], []
    h, wd, cin = H, W, cin0
    for (wt, bi) in convs:
        wt = wt.astype(jnp.float32)                   # (3, 3, Cin, Cout) HWIO
        bi = bi.astype(jnp.float32)
        cout = wt.shape[-1]
        ho, wo = (h - 1) // 2 + 1, (wd - 1) // 2 + 1
        S = jnp.asarray(_row_select(h, ho))           # (3*ho, h) constant 0/1
        tap = jnp.asarray(_col_taps(wd, wo))          # (3, wd, wo) constant 0/1
        # fold kw taps + channel mixing + batch block-diagonal into one matrix per kh
        m_kh = []
        for kh in range(3):
            mb = jnp.einsum('kio,kcj->icoj', wt[kh], tap).reshape(cin * wd, cout * wo)
            m_kh.append(jnp.kron(eye_b, mb))          # (B*Cin*W, B*Cout*Wo)
        M = jnp.stack(m_kh, axis=0)                   # (3, B*Cin*W, B*Cout*Wo)
        brow = jnp.broadcast_to(bi[None, :, None], (B, cout, wo)).reshape(1, B * cout * wo)
        args += [S, M, brow]
        in_specs += [vmem, vmem, vmem]
        hos.append(ho)
        h, wd, cin = ho, wo, cout

    # flatten is a pure relabelling only once the spatial extent collapses to 1x1
    assert h == 1 and wd == 1, "inshape must reduce to 1x1 after the conv stack"
    lw_blk = jnp.kron(eye_b, lw.astype(jnp.float32))            # (B*Clast, B*9)
    lb_row = jnp.tile(lb.astype(jnp.float32)[None, :], (1, B))  # (1, B*9)
    args += [lw_blk, lb_row]
    in_specs += [vmem, vmem]

    kernel = functools.partial(_fused_affine_kernel, hos=tuple(hos), batch=B,
                               n_layers=len(convs), neg_slope=NEG_SLOPE)
    flat = pl.pallas_call(
        kernel,
        out_shape=jax.ShapeDtypeStruct((1, B * 9), jnp.float32),
        in_specs=in_specs,
        out_specs=vmem,
    )(*args)
    return flat.reshape(B, 3, 3)


# ------------------------------------------------------------------------ pure-JAX reference
def _reference_forward(params, x1_nchw, x2_nchw):
    convs, (lw, lb), _ = params
    x = jnp.concatenate([x1_nchw, x2_nchw], axis=1)
    x = jnp.transpose(x, (0, 2, 3, 1))                       # NHWC
    for (wt, bi) in convs:
        x = jax.lax.conv_general_dilated(
            x, wt, window_strides=(2, 2), padding=((1, 1), (1, 1)),
            dimension_numbers=("NHWC", "HWIO", "NHWC"),
            precision=jax.lax.Precision.HIGHEST)
        x = x + bi
        x = jnp.where(x > 0, x, NEG_SLOPE * x)
    B = x.shape[0]
    feats = x.reshape(B, -1)                                 # spatial is 1x1
    logits = jnp.dot(feats, lw, precision=jax.lax.Precision.HIGHEST) + lb
    trans = jnp.tanh(logits[:, 0])
    sx, sy = logits[:, 2], logits[:, 3]
    ang = logits[:, 4]
    cx, cy = logits[:, 5], logits[:, 6]
    rad = ang * (math.pi / 180.0)
    c, s = jnp.cos(rad), jnp.sin(rad)
    m00, m01, m10, m11 = c * sx, -s * sy, s * sx, c * sy
    tx = cx - (m00 * cx + m01 * cy)
    ty = cy - (m10 * cx + m11 * cy)
    A = jnp.zeros((B, 3, 3), jnp.float32)
    A = A.at[:, 0, 0].set(m00).at[:, 0, 1].set(m01).at[:, 0, 2].set(tx)
    A = A.at[:, 1, 0].set(m10).at[:, 1, 1].set(m11).at[:, 1, 2].set(ty)
    A = A.at[:, 2, 2].set(1.0)
    A = A.at[:, :2, 2].add(trans)    # quirky (B,) vs (B,2) broadcast; valid for B in {1, 2}
    return A


if __name__ == "__main__":
    key = jax.random.PRNGKey(0)
    k1, k2, kp = jax.random.split(key, 3)
    B, inshape = 2, (32, 32)
    x1 = jax.random.normal(k1, (B, 1, *inshape), jnp.float32)
    x2 = jax.random.normal(k2, (B, 1, *inshape), jnp.float32)
    params = init_params(kp, inshape=inshape)

    fwd = jax.jit(affine_generator_forward)
    A = jax.block_until_ready(fwd(params, x1, x2))
    assert A.shape == (B, 3, 3) and A.dtype == jnp.float32

    A_ref = jax.block_until_ready(_reference_forward(params, x1, x2))
    np.testing.assert_allclose(np.asarray(A), np.asarray(A_ref), rtol=2e-3, atol=2e-3)
    print("KERNEL_OK")
</pallas_src>

<mosaic_0001>
module attributes {stable_mosaic.version = 11 : i64} {
  func.func @_fused_affine_kernel(%arg0: memref<32x128xf32, #tpu.memory_space<vmem>>, %arg1: memref<48x32xf32, #tpu.memory_space<vmem>>, %arg2: memref<3x128x64xf32, #tpu.memory_space<vmem>>, %arg3: memref<1x64xf32, #tpu.memory_space<vmem>>, %arg4: memref<24x16xf32, #tpu.memory_space<vmem>>, %arg5: memref<3x64x32xf32, #tpu.memory_space<vmem>>, %arg6: memref<1x32xf32, #tpu.memory_space<vmem>>, %arg7: memref<12x8xf32, #tpu.memory_space<vmem>>, %arg8: memref<3x32x16xf32, #tpu.memory_space<vmem>>, %arg9: memref<1x16xf32, #tpu.memory_space<vmem>>, %arg10: memref<6x4xf32, #tpu.memory_space<vmem>>, %arg11: memref<3x16x8xf32, #tpu.memory_space<vmem>>, %arg12: memref<1x8xf32, #tpu.memory_space<vmem>>, %arg13: memref<3x2xf32, #tpu.memory_space<vmem>>, %arg14: memref<3x8x4xf32, #tpu.memory_space<vmem>>, %arg15: memref<1x4xf32, #tpu.memory_space<vmem>>, %arg16: memref<4x18xf32, #tpu.memory_space<vmem>>, %arg17: memref<1x18xf32, #tpu.memory_space<vmem>>, %arg18: memref<1x18xf32, #tpu.memory_space<vmem>>) attributes {dimension_semantics = [], scalar_prefetch = 0 : i64, scratch_operands = 0 : i64, tpu.core_type = #tpu.core_type<tc>} {
    %c0 = arith.constant 0 : index
    %c0_0 = arith.constant 0 : index
    %0 = vector.load %arg0[%c0, %c0_0] : memref<32x128xf32, #tpu.memory_space<vmem>>, vector<32x128xf32>
    %c0_1 = arith.constant 0 : index
    %c0_2 = arith.constant 0 : index
    %1 = vector.load %arg1[%c0_1, %c0_2] : memref<48x32xf32, #tpu.memory_space<vmem>>, vector<48x32xf32>
    %c0_3 = arith.constant 0 : index
    %c0_4 = arith.constant 0 : index
    %2 = vector.load %arg3[%c0_3, %c0_4] : memref<1x64xf32, #tpu.memory_space<vmem>>, vector<1x64xf32>
    %cst = arith.constant dense<0.000000e+00> : vector<48x128xf32>
    %3 = tpu.matmul %1, %0, %cst {dimension_numbers = #tpu.dot_dimension_numbers<[1], [0], [0], [1], [0, 0, 1, 1], [], []>} : vector<48x32xf32>, vector<32x128xf32>, vector<48x128xf32> -> vector<48x128xf32>
    %4 = vector.extract_strided_slice %3 {offsets = [0, 0], sizes = [16, 128], strides = [1, 1]} : vector<48x128xf32> to vector<16x128xf32>
    %c0_5 = arith.constant 0 : index
    %c0_6 = arith.constant 0 : index
    %c0_7 = arith.constant 0 : index
    %5 = vector.load %arg2[%c0_5, %c0_6, %c0_7] : memref<3x128x64xf32, #tpu.memory_space<vmem>>, vector<1x128x64xf32>
    %6 = vector.shape_cast %5 : vector<1x128x64xf32> to vector<128x64xf32>
    %cst_8 = arith.constant dense<0.000000e+00> : vector<16x64xf32>
    %7 = tpu.matmul %4, %6, %cst_8 {dimension_numbers = #tpu.dot_dimension_numbers<[1], [0], [0], [1], [0, 0, 1, 1], [], []>} : vector<16x128xf32>, vector<128x64xf32>, vector<16x64xf32> -> vector<16x64xf32>
    %8 = vector.extract_strided_slice %3 {offsets = [16, 0], sizes = [16, 128], strides = [1, 1]} : vector<48x128xf32> to vector<16x128xf32>
    %c1 = arith.constant 1 : index
    %c0_9 = arith.constant 0 : index
    %c0_10 = arith.constant 0 : index
    %9 = vector.load %arg2[%c1, %c0_9, %c0_10] : memref<3x128x64xf32, #tpu.memory_space<vmem>>, vector<1x128x64xf32>
    %10 = vector.shape_cast %9 : vector<1x128x64xf32> to vector<128x64xf32>
    %cst_11 = arith.constant dense<0.000000e+00> : vector<16x64xf32>
    %11 = tpu.matmul %8, %10, %cst_11 {dimension_numbers = #tpu.dot_dimension_numbers<[1], [0], [0], [1], [0, 0, 1, 1], [], []>} : vector<16x128xf32>, vector<128x64xf32>, vector<16x64xf32> -> vector<16x64xf32>
    %12 = arith.addf %7, %11 : vector<16x64xf32>
    %13 = vector.extract_strided_slice %3 {offsets = [32, 0], sizes = [16, 128], strides = [1, 1]} : vector<48x128xf32> to vector<16x128xf32>
    %c2 = arith.constant 2 : index
    %c0_12 = arith.constant 0 : index
    %c0_13 = arith.constant 0 : index
    %14 = vector.load %arg2[%c2, %c0_12, %c0_13] : memref<3x128x64xf32, #tpu.memory_space<vmem>>, vector<1x128x64xf32>
    %15 = vector.shape_cast %14 : vector<1x128x64xf32> to vector<128x64xf32>
    %cst_14 = arith.constant dense<0.000000e+00> : vector<16x64xf32>
    %16 = tpu.matmul %13, %15, %cst_14 {dimension_numbers = #tpu.dot_dimension_numbers<[1], [0], [0], [1], [0, 0, 1, 1], [], []>} : vector<16x128xf32>, vector<128x64xf32>, vector<16x64xf32> -> vector<16x64xf32>
    %17 = arith.addf %12, %16 : vector<16x64xf32>
    %18 = vector.broadcast %2 : vector<1x64xf32> to vector<16x64xf32>
    %19 = arith.addf %17, %18 : vector<16x64xf32>
    %cst_15 = arith.constant 2.000000e-01 : f32
    %20 = vector.broadcast %cst_15 : f32 to vector<16x64xf32>
    %21 = arith.mulf %20, %19 : vector<16x64xf32>
    %22 = arith.maximumf %19, %21 : vector<16x64xf32>
    %c0_16 = arith.constant 0 : index
    %c0_17 = arith.constant 0 : index
    %23 = vector.load %arg4[%c0_16, %c0_17] : memref<24x16xf32, #tpu.memory_space<vmem>>, vector<24x16xf32>
    %c0_18 = arith.constant 0 : index
    %c0_19 = arith.constant 0 : index
    %24 = vector.load %arg6[%c0_18, %c0_19] : memref<1x32xf32, #tpu.memory_space<vmem>>, vector<1x32xf32>
    %cst_20 = arith.constant dense<0.000000e+00> : vector<24x64xf32>
    %25 = tpu.matmul %23, %22, %cst_20 {dimension_numbers = #tpu.dot_dimension_numbers<[1], [0], [0], [1], [0, 0, 1, 1], [], []>} : vector<24x16xf32>, vector<16x64xf32>, vector<24x64xf32> -> vector<24x64xf32>
    %26 = vector.extract_strided_slice %25 {offsets = [0, 0], sizes = [8, 64], strides = [1, 1]} : vector<24x64xf32> to vector<8x64xf32>
    %c0_21 = arith.constant 0 : index
    %c0_22 = arith.constant 0 : index
    %c0_23 = arith.constant 0 : index
    %27 = vector.load %arg5[%c0_21, %c0_22, %c0_23] : memref<3x64x32xf32, #tpu.memory_space<vmem>>, vector<1x64x32xf32>
    %28 = vector.shape_cast %27 : vector<1x64x32xf32> to vector<64x32xf32>
    %cst_24 = arith.constant dense<0.000000e+00> : vector<8x32xf32>
    %29 = tpu.matmul %26, %28, %cst_24 {dimension_numbers = #tpu.dot_dimension_numbers<[1], [0], [0], [1], [0, 0, 1, 1], [], []>} : vector<8x64xf32>, vector<64x32xf32>, vector<8x32xf32> -> vector<8x32xf32>
    %30 = vector.extract_strided_slice %25 {offsets = [8, 0], sizes = [8, 64], strides = [1, 1]} : vector<24x64xf32> to vector<8x64xf32>
    %c1_25 = arith.constant 1 : index
    %c0_26 = arith.constant 0 : index
    %c0_27 = arith.constant 0 : index
    %31 = vector.load %arg5[%c1_25, %c0_26, %c0_27] : memref<3x64x32xf32, #tpu.memory_space<vmem>>, vector<1x64x32xf32>
    %32 = vector.shape_cast %31 : vector<1x64x32xf32> to vector<64x32xf32>
    %cst_28 = arith.constant dense<0.000000e+00> : vector<8x32xf32>
    %33 = tpu.matmul %30, %32, %cst_28 {dimension_numbers = #tpu.dot_dimension_numbers<[1], [0], [0], [1], [0, 0, 1, 1], [], []>} : vector<8x64xf32>, vector<64x32xf32>, vector<8x32xf32> -> vector<8x32xf32>
    %34 = arith.addf %29, %33 : vector<8x32xf32>
    %35 = vector.extract_strided_slice %25 {offsets = [16, 0], sizes = [8, 64], strides = [1, 1]} : vector<24x64xf32> to vector<8x64xf32>
    %c2_29 = arith.constant 2 : index
    %c0_30 = arith.constant 0 : index
    %c0_31 = arith.constant 0 : index
    %36 = vector.load %arg5[%c2_29, %c0_30, %c0_31] : memref<3x64x32xf32, #tpu.memory_space<vmem>>, vector<1x64x32xf32>
    %37 = vector.shape_cast %36 : vector<1x64x32xf32> to vector<64x32xf32>
    %cst_32 = arith.constant dense<0.000000e+00> : vector<8x32xf32>
    %38 = tpu.matmul %35, %37, %cst_32 {dimension_numbers = #tpu.dot_dimension_numbers<[1], [0], [0], [1], [0, 0, 1, 1], [], []>} : vector<8x64xf32>, vector<64x32xf32>, vector<8x32xf32> -> vector<8x32xf32>
    %39 = arith.addf %34, %38 : vector<8x32xf32>
    %40 = vector.broadcast %24 : vector<1x32xf32> to vector<8x32xf32>
    %41 = arith.addf %39, %40 : vector<8x32xf32>
    %cst_33 = arith.constant 2.000000e-01 : f32
    %42 = vector.broadcast %cst_33 : f32 to vector<8x32xf32>
    %43 = arith.mulf %42, %41 : vector<8x32xf32>
    %44 = arith.maximumf %41, %43 : vector<8x32xf32>
    %c0_34 = arith.constant 0 : index
    %c0_35 = arith.constant 0 : index
    %45 = vector.load %arg7[%c0_34, %c0_35] : memref<12x8xf32, #tpu.memory_space<vmem>>, vector<12x8xf32>
    %c0_36 = arith.constant 0 : index
    %c0_37 = arith.constant 0 : index
    %46 = vector.load %arg9[%c0_36, %c0_37] : memref<1x16xf32, #tpu.memory_space<vmem>>, vector<1x16xf32>
    %cst_38 = arith.constant dense<0.000000e+00> : vector<12x32xf32>
    %47 = tpu.matmul %45, %44, %cst_38 {dimension_numbers = #tpu.dot_dimension_numbers<[1], [0], [0], [1], [0, 0, 1, 1], [], []>} : vector<12x8xf32>, vector<8x32xf32>, vector<12x32xf32> -> vector<12x32xf32>
    %48 = vector.extract_strided_slice %47 {offsets = [0, 0], sizes = [4, 32], strides = [1, 1]} : vector<12x32xf32> to vector<4x32xf32>
    %c0_39 = arith.constant 0 : index
    %c0_40 = arith.constant 0 : index
    %c0_41 = arith.constant 0 : index
    %49 = vector.load %arg8[%c0_39, %c0_40, %c0_41] : memref<3x32x16xf32, #tpu.memory_space<vmem>>, vector<1x32x16xf32>
    %50 = vector.shape_cast %49 : vector<1x32x16xf32> to vector<32x16xf32>
    %cst_42 = arith.constant dense<0.000000e+00> : vector<4x16xf32>
    %51 = tpu.matmul %48, %50, %cst_42 {dimension_numbers = #tpu.dot_dimension_numbers<[1], [0], [0], [1], [0, 0, 1, 1], [], []>} : vector<4x32xf32>, vector<32x16xf32>, vector<4x16xf32> -> vector<4x16xf32>
    %52 = vector.extract_strided_slice %47 {offsets = [4, 0], sizes = [4, 32], strides = [1, 1]} : vector<12x32xf32> to vector<4x32xf32>
    %c1_43 = arith.constant 1 : index
    %c0_44 = arith.constant 0 : index
    %c0_45 = arith.constant 0 : index
    %53 = vector.load %arg8[%c1_43, %c0_44, %c0_45] : memref<3x32x16xf32, #tpu.memory_space<vmem>>, vector<1x32x16xf32>
    %54 = vector.shape_cast %53 : vector<1x32x16xf32> to vector<32x16xf32>
    %cst_46 = arith.constant dense<0.000000e+00> : vector<4x16xf32>
    %55 = tpu.matmul %52, %54, %cst_46 {dimension_numbers = #tpu.dot_dimension_numbers<[1], [0], [0], [1], [0, 0, 1, 1], [], []>} : vector<4x32xf32>, vector<32x16xf32>, vector<4x16xf32> -> vector<4x16xf32>
    %56 = arith.addf %51, %55 : vector<4x16xf32>
    %57 = vector.extract_strided_slice %47 {offsets = [8, 0], sizes = [4, 32], strides = [1, 1]} : vector<12x32xf32> to vector<4x32xf32>
    %c2_47 = arith.constant 2 : index
    %c0_48 = arith.constant 0 : index
    %c0_49 = arith.constant 0 : index
    %58 = vector.load %arg8[%c2_47, %c0_48, %c0_49] : memref<3x32x16xf32, #tpu.memory_space<vmem>>, vector<1x32x16xf32>
    %59 = vector.shape_cast %58 : vector<1x32x16xf32> to vector<32x16xf32>
    %cst_50 = arith.constant dense<0.000000e+00> : vector<4x16xf32>
    %60 = tpu.matmul %57, %59, %cst_50 {dimension_numbers = #tpu.dot_dimension_numbers<[1], [0], [0], [1], [0, 0, 1, 1], [], []>} : vector<4x32xf32>, vector<32x16xf32>, vector<4x16xf32> -> vector<4x16xf32>
    %61 = arith.addf %56, %60 : vector<4x16xf32>
    %62 = vector.broadcast %46 : vector<1x16xf32> to vector<4x16xf32>
    %63 = arith.addf %61, %62 : vector<4x16xf32>
    %cst_51 = arith.constant 2.000000e-01 : f32
    %64 = vector.broadcast %cst_51 : f32 to vector<4x16xf32>
    %65 = arith.mulf %64, %63 : vector<4x16xf32>
    %66 = arith.maximumf %63, %65 : vector<4x16xf32>
    %c0_52 = arith.constant 0 : index
    %c0_53 = arith.constant 0 : index
    %67 = vector.load %arg10[%c0_52, %c0_53] : memref<6x4xf32, #tpu.memory_space<vmem>>, vector<6x4xf32>
    %c0_54 = arith.constant 0 : index
    %c0_55 = arith.constant 0 : index
    %68 = vector.load %arg12[%c0_54, %c0_55] : memref<1x8xf32, #tpu.memory_space<vmem>>, vector<1x8xf32>
    %cst_56 = arith.constant dense<0.000000e+00> : vector<6x16xf32>
    %69 = tpu.matmul %67, %66, %cst_56 {dimension_numbers = #tpu.dot_dimension_numbers<[1], [0], [0], [1], [0, 0, 1, 1], [], []>} : vector<6x4xf32>, vector<4x16xf32>, vector<6x16xf32> -> vector<6x16xf32>
    %70 = vector.extract_strided_slice %69 {offsets = [0, 0], sizes = [2, 16], strides = [1, 1]} : vector<6x16xf32> to vector<2x16xf32>
    %c0_57 = arith.constant 0 : index
    %c0_58 = arith.constant 0 : index
    %c0_59 = arith.constant 0 : index
    %71 = vector.load %arg11[%c0_57, %c0_58, %c0_59] : memref<3x16x8xf32, #tpu.memory_space<vmem>>, vector<1x16x8xf32>
    %72 = vector.shape_cast %71 : vector<1x16x8xf32> to vector<16x8xf32>
    %cst_60 = arith.constant dense<0.000000e+00> : vector<2x8xf32>
    %73 = tpu.matmul %70, %72, %cst_60 {dimension_numbers = #tpu.dot_dimension_numbers<[1], [0], [0], [1], [0, 0, 1, 1], [], []>} : vector<2x16xf32>, vector<16x8xf32>, vector<2x8xf32> -> vector<2x8xf32>
    %74 = vector.extract_strided_slice %69 {offsets = [2, 0], sizes = [2, 16], strides = [1, 1]} : vector<6x16xf32> to vector<2x16xf32>
    %c1_61 = arith.constant 1 : index
    %c0_62 = arith.constant 0 : index
    %c0_63 = arith.constant 0 : index
    %75 = vector.load %arg11[%c1_61, %c0_62, %c0_63] : memref<3x16x8xf32, #tpu.memory_space<vmem>>, vector<1x16x8xf32>
    %76 = vector.shape_cast %75 : vector<1x16x8xf32> to vector<16x8xf32>
    %cst_64 = arith.constant dense<0.000000e+00> : vector<2x8xf32>
    %77 = tpu.matmul %74, %76, %cst_64 {dimension_numbers = #tpu.dot_dimension_numbers<[1], [0], [0], [1], [0, 0, 1, 1], [], []>} : vector<2x16xf32>, vector<16x8xf32>, vector<2x8xf32> -> vector<2x8xf32>
    %78 = arith.addf %73, %77 : vector<2x8xf32>
    %79 = vector.extract_strided_slice %69 {offsets = [4, 0], sizes = [2, 16], strides = [1, 1]} : vector<6x16xf32> to vector<2x16xf32>
    %c2_65 = arith.constant 2 : index
    %c0_66 = arith.constant 0 : index
    %c0_67 = arith.constant 0 : index
    %80 = vector.load %arg11[%c2_65, %c0_66, %c0_67] : memref<3x16x8xf32, #tpu.memory_space<vmem>>, vector<1x16x8xf32>
    %81 = vector.shape_cast %80 : vector<1x16x8xf32> to vector<16x8xf32>
    %cst_68 = arith.constant dense<0.000000e+00> : vector<2x8xf32>
    %82 = tpu.matmul %79, %81, %cst_68 {dimension_numbers = #tpu.dot_dimension_numbers<[1], [0], [0], [1], [0, 0, 1, 1], [], []>} : vector<2x16xf32>, vector<16x8xf32>, vector<2x8xf32> -> vector<2x8xf32>
    %83 = arith.addf %78, %82 : vector<2x8xf32>
    %84 = vector.broadcast %68 : vector<1x8xf32> to vector<2x8xf32>
    %85 = arith.addf %83, %84 : vector<2x8xf32>
    %cst_69 = arith.constant 2.000000e-01 : f32
    %86 = vector.broadcast %cst_69 : f32 to vector<2x8xf32>
    %87 = arith.mulf %86, %85 : vector<2x8xf32>
    %88 = arith.maximumf %85, %87 : vector<2x8xf32>
    %c0_70 = arith.constant 0 : index
    %c0_71 = arith.constant 0 : index
    %89 = vector.load %arg13[%c0_70, %c0_71] : memref<3x2xf32, #tpu.memory_space<vmem>>, vector<3x2xf32>
    %c0_72 = arith.constant 0 : index
    %c0_73 = arith.constant 0 : index
    %90 = vector.load %arg15[%c0_72, %c0_73] : memref<1x4xf32, #tpu.memory_space<vmem>>, vector<1x4xf32>
    %cst_74 = arith.constant dense<0.000000e+00> : vector<3x8xf32>
    %91 = tpu.matmul %89, %88, %cst_74 {dimension_numbers = #tpu.dot_dimension_numbers<[1], [0], [0], [1], [0, 0, 1, 1], [], []>} : vector<3x2xf32>, vector<2x8xf32>, vector<3x8xf32> -> vector<3x8xf32>
    %92 = vector.extract_strided_slice %91 {offsets = [0, 0], sizes = [1, 8], strides = [1, 1]} : vector<3x8xf32> to vector<1x8xf32>
    %c0_75 = arith.constant 0 : index
    %c0_76 = arith.constant 0 : index
    %c0_77 = arith.constant 0 : index
    %93 = vector.load %arg14[%c0_75, %c0_76, %c0_77] : memref<3x8x4xf32, #tpu.memory_space<vmem>>, vector<1x8x4xf32>
    %94 = vector.shape_cast %93 : vector<1x8x4xf32> to vector<8x4xf32>
    %cst_78 = arith.constant dense<0.000000e+00> : vector<1x4xf32>
    %95 = tpu.matmul %92, %94, %cst_78 {dimension_numbers = #tpu.dot_dimension_numbers<[1], [0], [0], [1], [0, 0, 1, 1], [], []>} : vector<1x8xf32>, vector<8x4xf32>, vector<1x4xf32> -> vector<1x4xf32>
    %96 = vector.extract_strided_slice %91 {offsets = [1, 0], sizes = [1, 8], strides = [1, 1]} : vector<3x8xf32> to vector<1x8xf32>
    %c1_79 = arith.constant 1 : index
    %c0_80 = arith.constant 0 : index
    %c0_81 = arith.constant 0 : index
    %97 = vector.load %arg14[%c1_79, %c0_80, %c0_81] : memref<3x8x4xf32, #tpu.memory_space<vmem>>, vector<1x8x4xf32>
    %98 = vector.shape_cast %97 : vector<1x8x4xf32> to vector<8x4xf32>
    %cst_82 = arith.constant dense<0.000000e+00> : vector<1x4xf32>
    %99 = tpu.matmul %96, %98, %cst_82 {dimension_numbers = #tpu.dot_dimension_numbers<[1], [0], [0], [1], [0, 0, 1, 1], [], []>} : vector<1x8xf32>, vector<8x4xf32>, vector<1x4xf32> -> vector<1x4xf32>
    %100 = arith.addf %95, %99 : vector<1x4xf32>
    %101 = vector.extract_strided_slice %91 {offsets = [2, 0], sizes = [1, 8], strides = [1, 1]} : vector<3x8xf32> to vector<1x8xf32>
    %c2_83 = arith.constant 2 : index
    %c0_84 = arith.constant 0 : index
    %c0_85 = arith.constant 0 : index
    %102 = vector.load %arg14[%c2_83, %c0_84, %c0_85] : memref<3x8x4xf32, #tpu.memory_space<vmem>>, vector<1x8x4xf32>
    %103 = vector.shape_cast %102 : vector<1x8x4xf32> to vector<8x4xf32>
    %cst_86 = arith.constant dense<0.000000e+00> : vector<1x4xf32>
    %104 = tpu.matmul %101, %103, %cst_86 {dimension_numbers = #tpu.dot_dimension_numbers<[1], [0], [0], [1], [0, 0, 1, 1], [], []>} : vector<1x8xf32>, vector<8x4xf32>, vector<1x4xf32> -> vector<1x4xf32>
    %105 = arith.addf %100, %104 : vector<1x4xf32>
    %106 = arith.addf %105, %90 : vector<1x4xf32>
    %cst_87 = arith.constant 2.000000e-01 : f32
    %107 = vector.broadcast %cst_87 : f32 to vector<1x4xf32>
    %108 = arith.mulf %107, %106 : vector<1x4xf32>
    %109 = arith.maximumf %106, %108 : vector<1x4xf32>
    %c0_88 = arith.constant 0 : index
    %c0_89 = arith.constant 0 : index
    %110 = vector.load %arg16[%c0_88, %c0_89] : memref<4x18xf32, #tpu.memory_space<vmem>>, vector<4x18xf32>
    %cst_90 = arith.constant dense<0.000000e+00> : vector<1x18xf32>
    %111 = tpu.matmul %109, %110, %cst_90 {dimension_numbers = #tpu.dot_dimension_numbers<[1], [0], [0], [1], [0, 0, 1, 1], [], []>} : vector<1x4xf32>, vector<4x18xf32>, vector<1x18xf32> -> vector<1x18xf32>
    %c0_91 = arith.constant 0 : index
    %c0_92 = arith.constant 0 : index
    %112 = vector.load %arg17[%c0_91, %c0_92] : memref<1x18xf32, #tpu.memory_space<vmem>>, vector<1x18xf32>
    %113 = arith.addf %111, %112 : vector<1x18xf32>
    %114 = vector.extract_strided_slice %113 {offsets = [0, 0], sizes = [1, 1], strides = [1, 1]} : vector<1x18xf32> to vector<1x1xf32>
    %115 = math.tanh %114 : vector<1x1xf32>
    %116 = vector.extract_strided_slice %113 {offsets = [0, 9], sizes = [1, 1], strides = [1, 1]} : vector<1x18xf32> to vector<1x1xf32>
    %117 = math.tanh %116 : vector<1x1xf32>
    %118 = tpu.iota {dimensions = array<i32: 1>} : vector<1x18xi32>
    %cst_93 = arith.constant 0.000000e+00 : f32
    %119 = vector.broadcast %cst_93 : f32 to vector<1x18xf32>
    %120 = vector.extract_strided_slice %113 {offsets = [0, 2], sizes = [1, 1], strides = [1, 1]} : vector<1x18xf32> to vector<1x1xf32>
    %121 = vector.extract_strided_slice %113 {offsets = [0, 3], sizes = [1, 1], strides = [1, 1]} : vector<1x18xf32> to vector<1x1xf32>
    %122 = vector.extract_strided_slice %113 {offsets = [0, 4], sizes = [1, 1], strides = [1, 1]} : vector<1x18xf32> to vector<1x1xf32>
    %123 = vector.extract_strided_slice %113 {offsets = [0, 5], sizes = [1, 1], strides = [1, 1]} : vector<1x18xf32> to vector<1x1xf32>
    %124 = vector.extract_strided_slice %113 {offsets = [0, 6], sizes = [1, 1], strides = [1, 1]} : vector<1x18xf32> to vector<1x1xf32>
    %cst_94 = arith.constant 0.0174532924 : f32
    %125 = vector.broadcast %cst_94 : f32 to vector<1x1xf32>
    %126 = arith.mulf %122, %125 : vector<1x1xf32>
    %127 = math.cos %126 : vector<1x1xf32>
    %128 = math.sin %126 : vector<1x1xf32>
    %129 = arith.mulf %127, %120 : vector<1x1xf32>
    %cst_95 = arith.constant 0.000000e+00 : f32
    %130 = vector.broadcast %cst_95 : f32 to vector<1x1xf32>
    %131 = arith.subf %130, %128 : vector<1x1xf32>
    %132 = arith.mulf %131, %121 : vector<1x1xf32>
    %133 = arith.mulf %128, %120 : vector<1x1xf32>
    %134 = arith.mulf %127, %121 : vector<1x1xf32>
    %135 = arith.mulf %129, %123 : vector<1x1xf32>
    %136 = arith.mulf %132, %124 : vector<1x1xf32>
    %137 = arith.addf %135, %136 : vector<1x1xf32>
    %138 = arith.subf %123, %137 : vector<1x1xf32>
    %139 = arith.mulf %133, %123 : vector<1x1xf32>
    %140 = arith.mulf %134, %124 : vector<1x1xf32>
    %141 = arith.addf %139, %140 : vector<1x1xf32>
    %142 = arith.subf %124, %141 : vector<1x1xf32>
    %143 = arith.addf %138, %115 : vector<1x1xf32>
    %144 = arith.addf %142, %117 : vector<1x1xf32>
    %c0_i32 = arith.constant 0 : i32
    %145 = vector.broadcast %c0_i32 : i32 to vector<1x18xi32>
    %146 = arith.cmpi eq, %118, %145 : vector<1x18xi32>
    %cst_96 = arith.constant 0.000000e+00 : f32
    %147 = vector.shape_cast %129 : vector<1x1xf32> to vector<1x1xf32>
    %148 = vector.broadcast %147 : vector<1x1xf32> to vector<1x18xf32>
    %149 = vector.broadcast %cst_96 : f32 to vector<1x18xf32>
    %150 = arith.select %146, %148, %149 : vector<1x18xi1>, vector<1x18xf32>
    %151 = arith.addf %119, %150 : vector<1x18xf32>
    %c1_i32 = arith.constant 1 : i32
    %152 = vector.broadcast %c1_i32 : i32 to vector<1x18xi32>
    %153 = arith.cmpi eq, %118, %152 : vector<1x18xi32>
    %cst_97 = arith.constant 0.000000e+00 : f32
    %154 = vector.shape_cast %132 : vector<1x1xf32> to vector<1x1xf32>
    %155 = vector.broadcast %154 : vector<1x1xf32> to vector<1x18xf32>
    %156 = vector.broadcast %cst_97 : f32 to vector<1x18xf32>
    %157 = arith.select %153, %155, %156 : vector<1x18xi1>, vector<1x18xf32>
    %158 = arith.addf %151, %157 : vector<1x18xf32>
    %c2_i32 = arith.constant 2 : i32
    %159 = vector.broadcast %c2_i32 : i32 to vector<1x18xi32>
    %160 = arith.cmpi eq, %118, %159 : vector<1x18xi32>
    %cst_98 = arith.constant 0.000000e+00 : f32
    %161 = vector.shape_cast %143 : vector<1x1xf32> to vector<1x1xf32>
    %162 = vector.broadcast %161 : vector<1x1xf32> to vector<1x18xf32>
    %163 = vector.broadcast %cst_98 : f32 to vector<1x18xf32>
    %164 = arith.select %160, %162, %163 : vector<1x18xi1>, vector<1x18xf32>
    %165 = arith.addf %158, %164 : vector<1x18xf32>
    %c3_i32 = arith.constant 3 : i32
    %166 = vector.broadcast %c3_i32 : i32 to vector<1x18xi32>
    %167 = arith.cmpi eq, %118, %166 : vector<1x18xi32>
    %cst_99 = arith.constant 0.000000e+00 : f32
    %168 = vector.shape_cast %133 : vector<1x1xf32> to vector<1x1xf32>
    %169 = vector.broadcast %168 : vector<1x1xf32> to vector<1x18xf32>
    %170 = vector.broadcast %cst_99 : f32 to vector<1x18xf32>
    %171 = arith.select %167, %169, %170 : vector<1x18xi1>, vector<1x18xf32>
    %172 = arith.addf %165, %171 : vector<1x18xf32>
    %c4_i32 = arith.constant 4 : i32
    %173 = vector.broadcast %c4_i32 : i32 to vector<1x18xi32>
    %174 = arith.cmpi eq, %118, %173 : vector<1x18xi32>
    %cst_100 = arith.constant 0.000000e+00 : f32
    %175 = vector.shape_cast %134 : vector<1x1xf32> to vector<1x1xf32>
    %176 = vector.broadcast %175 : vector<1x1xf32> to vector<1x18xf32>
    %177 = vector.broadcast %cst_100 : f32 to vector<1x18xf32>
    %178 = arith.select %174, %176, %177 : vector<1x18xi1>, vector<1x18xf32>
    %179 = arith.addf %172, %178 : vector<1x18xf32>
    %c5_i32 = arith.constant 5 : i32
    %180 = vector.broadcast %c5_i32 : i32 to vector<1x18xi32>
    %181 = arith.cmpi eq, %118, %180 : vector<1x18xi32>
    %cst_101 = arith.constant 0.000000e+00 : f32
    %182 = vector.shape_cast %144 : vector<1x1xf32> to vector<1x1xf32>
    %183 = vector.broadcast %182 : vector<1x1xf32> to vector<1x18xf32>
    %184 = vector.broadcast %cst_101 : f32 to vector<1x18xf32>
    %185 = arith.select %181, %183, %184 : vector<1x18xi1>, vector<1x18xf32>
    %186 = arith.addf %179, %185 : vector<1x18xf32>
    %c8_i32 = arith.constant 8 : i32
    %187 = vector.broadcast %c8_i32 : i32 to vector<1x18xi32>
    %188 = arith.cmpi eq, %118, %187 : vector<1x18xi32>
    %cst_102 = arith.constant 1.000000e+00 : f32
    %cst_103 = arith.constant 0.000000e+00 : f32
    %189 = vector.broadcast %cst_102 : f32 to vector<1x18xf32>
    %190 = vector.broadcast %cst_103 : f32 to vector<1x18xf32>
    %191 = arith.select %188, %189, %190 : vector<1x18xi1>, vector<1x18xf32>
    %192 = arith.addf %186, %191 : vector<1x18xf32>
    %193 = vector.extract_strided_slice %113 {offsets = [0, 11], sizes = [1, 1], strides = [1, 1]} : vector<1x18xf32> to vector<1x1xf32>
    %194 = vector.extract_strided_slice %113 {offsets = [0, 12], sizes = [1, 1], strides = [1, 1]} : vector<1x18xf32> to vector<1x1xf32>
    %195 = vector.extract_strided_slice %113 {offsets = [0, 13], sizes = [1, 1], strides = [1, 1]} : vector<1x18xf32> to vector<1x1xf32>
    %196 = vector.extract_strided_slice %113 {offsets = [0, 14], sizes = [1, 1], strides = [1, 1]} : vector<1x18xf32> to vector<1x1xf32>
    %197 = vector.extract_strided_slice %113 {offsets = [0, 15], sizes = [1, 1], strides = [1, 1]} : vector<1x18xf32> to vector<1x1xf32>
    %cst_104 = arith.constant 0.0174532924 : f32
    %198 = vector.broadcast %cst_104 : f32 to vector<1x1xf32>
    %199 = arith.mulf %195, %198 : vector<1x1xf32>
    %200 = math.cos %199 : vector<1x1xf32>
    %201 = math.sin %199 : vector<1x1xf32>
    %202 = arith.mulf %200, %193 : vector<1x1xf32>
    %cst_105 = arith.constant 0.000000e+00 : f32
    %203 = vector.broadcast %cst_105 : f32 to vector<1x1xf32>
    %204 = arith.subf %203, %201 : vector<1x1xf32>
    %205 = arith.mulf %204, %194 : vector<1x1xf32>
    %206 = arith.mulf %201, %193 : vector<1x1xf32>
    %207 = arith.mulf %200, %194 : vector<1x1xf32>
    %208 = arith.mulf %202, %196 : vector<1x1xf32>
    %209 = arith.mulf %205, %197 : vector<1x1xf32>
    %210 = arith.addf %208, %209 : vector<1x1xf32>
    %211 = arith.subf %196, %210 : vector<1x1xf32>
    %212 = arith.mulf %206, %196 : vector<1x1xf32>
    %213 = arith.mulf %207, %197 : vector<1x1xf32>
    %214 = arith.addf %212, %213 : vector<1x1xf32>
    %215 = arith.subf %197, %214 : vector<1x1xf32>
    %216 = arith.addf %211, %115 : vector<1x1xf32>
    %217 = arith.addf %215, %117 : vector<1x1xf32>
    %c9_i32 = arith.constant 9 : i32
    %218 = vector.broadcast %c9_i32 : i32 to vector<1x18xi32>
    %219 = arith.cmpi eq, %118, %218 : vector<1x18xi32>
    %cst_106 = arith.constant 0.000000e+00 : f32
    %220 = vector.shape_cast %202 : vector<1x1xf32> to vector<1x1xf32>
    %221 = vector.broadcast %220 : vector<1x1xf32> to vector<1x18xf32>
    %222 = vector.broadcast %cst_106 : f32 to vector<1x18xf32>
    %223 = arith.select %219, %221, %222 : vector<1x18xi1>, vector<1x18xf32>
    %224 = arith.addf %192, %223 : vector<1x18xf32>
    %c10_i32 = arith.constant 10 : i32
    %225 = vector.broadcast %c10_i32 : i32 to vector<1x18xi32>
    %226 = arith.cmpi eq, %118, %225 : vector<1x18xi32>
    %cst_107 = arith.constant 0.000000e+00 : f32
    %227 = vector.shape_cast %205 : vector<1x1xf32> to vector<1x1xf32>
    %228 = vector.broadcast %227 : vector<1x1xf32> to vector<1x18xf32>
    %229 = vector.broadcast %cst_107 : f32 to vector<1x18xf32>
    %230 = arith.select %226, %228, %229 : vector<1x18xi1>, vector<1x18xf32>
    %231 = arith.addf %224, %230 : vector<1x18xf32>
    %c11_i32 = arith.constant 11 : i32
    %232 = vector.broadcast %c11_i32 : i32 to vector<1x18xi32>
    %233 = arith.cmpi eq, %118, %232 : vector<1x18xi32>
    %cst_108 = arith.constant 0.000000e+00 : f32
    %234 = vector.shape_cast %216 : vector<1x1xf32> to vector<1x1xf32>
    %235 = vector.broadcast %234 : vector<1x1xf32> to vector<1x18xf32>
    %236 = vector.broadcast %cst_108 : f32 to vector<1x18xf32>
    %237 = arith.select %233, %235, %236 : vector<1x18xi1>, vector<1x18xf32>
    %238 = arith.addf %231, %237 : vector<1x18xf32>
    %c12_i32 = arith.constant 12 : i32
    %239 = vector.broadcast %c12_i32 : i32 to vector<1x18xi32>
    %240 = arith.cmpi eq, %118, %239 : vector<1x18xi32>
    %cst_109 = arith.constant 0.000000e+00 : f32
    %241 = vector.shape_cast %206 : vector<1x1xf32> to vector<1x1xf32>
    %242 = vector.broadcast %241 : vector<1x1xf32> to vector<1x18xf32>
    %243 = vector.broadcast %cst_109 : f32 to vector<1x18xf32>
    %244 = arith.select %240, %242, %243 : vector<1x18xi1>, vector<1x18xf32>
    %245 = arith.addf %238, %244 : vector<1x18xf32>
    %c13_i32 = arith.constant 13 : i32
    %246 = vector.broadcast %c13_i32 : i32 to vector<1x18xi32>
    %247 = arith.cmpi eq, %118, %246 : vector<1x18xi32>
    %cst_110 = arith.constant 0.000000e+00 : f32
    %248 = vector.shape_cast %207 : vector<1x1xf32> to vector<1x1xf32>
    %249 = vector.broadcast %248 : vector<1x1xf32> to vector<1x18xf32>
    %250 = vector.broadcast %cst_110 : f32 to vector<1x18xf32>
    %251 = arith.select %247, %249, %250 : vector<1x18xi1>, vector<1x18xf32>
    %252 = arith.addf %245, %251 : vector<1x18xf32>
    %c14_i32 = arith.constant 14 : i32
    %253 = vector.broadcast %c14_i32 : i32 to vector<1x18xi32>
    %254 = arith.cmpi eq, %118, %253 : vector<1x18xi32>
    %cst_111 = arith.constant 0.000000e+00 : f32
    %255 = vector.shape_cast %217 : vector<1x1xf32> to vector<1x1xf32>
    %256 = vector.broadcast %255 : vector<1x1xf32> to vector<1x18xf32>
    %257 = vector.broadcast %cst_111 : f32 to vector<1x18xf32>
    %258 = arith.select %254, %256, %257 : vector<1x18xi1>, vector<1x18xf32>
    %259 = arith.addf %252, %258 : vector<1x18xf32>
    %c17_i32 = arith.constant 17 : i32
    %260 = vector.broadcast %c17_i32 : i32 to vector<1x18xi32>
    %261 = arith.cmpi eq, %118, %260 : vector<1x18xi32>
    %cst_112 = arith.constant 1.000000e+00 : f32
    %cst_113 = arith.constant 0.000000e+00 : f32
    %262 = vector.broadcast %cst_112 : f32 to vector<1x18xf32>
    %263 = vector.broadcast %cst_113 : f32 to vector<1x18xf32>
    %264 = arith.select %261, %262, %263 : vector<1x18xi1>, vector<1x18xf32>
    %265 = arith.addf %259, %264 : vector<1x18xf32>
    %c0_114 = arith.constant 0 : index
    %c0_115 = arith.constant 0 : index
    %266 = vector.load %arg18[%c0_114, %c0_115] : memref<1x18xf32, #tpu.memory_space<vmem>>, vector<1x18xf32>
    tpu.vector_store %arg18[%c0_114, %c0_115], %265 {strides = array<i32>} : memref<1x18xf32, #tpu.memory_space<vmem>>, vector<1x18xf32>,
    return
  }
}

</mosaic_0001>

<bundles_post_ra>
// kernel: mul.4
= control target key start
LH: loop header
LB: loop body
LE: loop exit
PB: predicated region body
PF: predicated region fallthrough
CT: control target
= control target key end

     0   :  { %vm162_vm0 = vcmask 1047556   ;;  %s304_s10 = smov 32   ;;  %vm164_vm1 = vcmask 261120   ;;  %vm201_vm2 = vcmask 523520   ;;  %s451_s0 = inlined_call_operand.vmem [shape: f32[2,32,2,16], index: 0, kind: input, shape index: {}]   ;;  %s452_s1 = inlined_call_operand.vmem [shape: f32[64,32], index: 1, kind: output, shape index: {}]  }
   0x1   :  { %v290_v0 = vld [vmem:[%s451_s0 + $0xe] sm:$0x3]  ;;  %v291_v1 = vld [vmem:[%s451_s0 + $0xc] sm:$0x3]  ;;  %v292_v2 = vld [vmem:[%s451_s0 + $0xa] sm:$0x3] }
   0x2   :  { %128 = vst [vmem:[#allocation0 + $0x38] sm:$0x3] %v290_v0  ;;  %133 = vst [vmem:[#allocation0 + $0x30] sm:$0x3] %v291_v1  ;;  %v293_v3 = vld [vmem:[%s451_s0 + $0x8] sm:$0x3] }
   0x3   :  { %138 = vst [vmem:[#allocation0 + $0x28] sm:$0x3] %v292_v2  ;;  %v294_v4 = vld [vmem:[%s451_s0 + $0x6] sm:$0x3]  ;;  %v295_v5 = vld [vmem:[%s451_s0 + $0x4] sm:$0x3] }
   0x4   :  { %143 = vst [vmem:[#allocation0 + $0x20] sm:$0x3] %v293_v3  ;;  %148 = vst [vmem:[#allocation0 + $0x18] sm:$0x3] %v294_v4  ;;  %v296_v6 = vld [vmem:[%s451_s0 + $0x2] sm:$0x3] }
   0x5   :  { %153 = vst [vmem:[#allocation0 + $0x10] sm:$0x3] %v295_v5  ;;  %v158_v7 = vld [vmem:[%s451_s0] sm:$0x3]  ;;  %157 = vst [vmem:[#allocation0 + $0x8] sm:$0x3] %v296_v6 }
   0x6   :  { %159 = vst [vmem:[#allocation0] sm:$0x3] %v158_v7  ;;  %v274_v8 = vld [vmem:[%s451_s0 + $0x2e] sm:$0x3]  ;;  %v275_v9 = vld [vmem:[%s451_s0 + $0x2c] sm:$0x3] }
   0x7   :  { %v276_v10 = vld [vmem:[%s451_s0 + $0x2a] sm:$0x3]  ;;  %48 = vst [vmem:[#allocation0 + $0xb8] sm:$0x3] %v274_v8  ;;  %53 = vst [vmem:[#allocation0 + $0xb0] sm:$0x3] %v275_v9 }
   0x8   :  { %58 = vst [vmem:[#allocation0 + $0xa8] sm:$0x3] %v276_v10  ;;  %v277_v11 = vld [vmem:[%s451_s0 + $0x28] sm:$0x3]  ;;  %v278_v12 = vld [vmem:[%s451_s0 + $0x26] sm:$0x3] }
   0x9   :  { %v279_v13 = vld [vmem:[%s451_s0 + $0x24] sm:$0x3]  ;;  %63 = vst [vmem:[#allocation0 + $0xa0] sm:$0x3] %v277_v11  ;;  %68 = vst [vmem:[#allocation0 + $0x98] sm:$0x3] %v278_v12 }
   0xa   :  { %73 = vst [vmem:[#allocation0 + $0x90] sm:$0x3] %v279_v13  ;;  %v280_v14 = vld [vmem:[%s451_s0 + $0x22] sm:$0x3]  ;;  %v281_v15 = vld [vmem:[%s451_s0 + $0x20] sm:$0x3] }
   0xb   :  { %v282_v16 = vld [vmem:[%s451_s0 + $0x1e] sm:$0x3]  ;;  %78 = vst [vmem:[#allocation0 + $0x88] sm:$0x3] %v280_v14  ;;  %83 = vst [vmem:[#allocation0 + $0x80] sm:$0x3] %v281_v15 }
   0xc   :  { %88 = vst [vmem:[#allocation0 + $0x78] sm:$0x3] %v282_v16  ;;  %v283_v17 = vld [vmem:[%s451_s0 + $0x1c] sm:$0x3]  ;;  %v284_v18 = vld [vmem:[%s451_s0 + $0x1a] sm:$0x3] }
   0xd   :  { %v285_v19 = vld [vmem:[%s451_s0 + $0x18] sm:$0x3]  ;;  %93 = vst [vmem:[#allocation0 + $0x70] sm:$0x3] %v283_v17  ;;  %98 = vst [vmem:[#allocation0 + $0x68] sm:$0x3] %v284_v18 }
   0xe   :  { %103 = vst [vmem:[#allocation0 + $0x60] sm:$0x3] %v285_v19  ;;  %v286_v20 = vld [vmem:[%s451_s0 + $0x16] sm:$0x3]  ;;  %v287_v21 = vld [vmem:[%s451_s0 + $0x14] sm:$0x3] }
   0xf   :  { %v288_v22 = vld [vmem:[%s451_s0 + $0x12] sm:$0x3]  ;;  %108 = vst [vmem:[#allocation0 + $0x58] sm:$0x3] %v286_v20  ;;  %113 = vst [vmem:[#allocation0 + $0x50] sm:$0x3] %v287_v21 }
  0x10   :  { %118 = vst [vmem:[#allocation0 + $0x48] sm:$0x3] %v288_v22  ;;  %v289_v23 = vld [vmem:[%s451_s0 + $0x10] sm:$0x3]  ;;  %v266_v24 = vld [vmem:[%s451_s0 + $0x3e] sm:$0x3] }
  0x11   :  { %v267_v25 = vld [vmem:[%s451_s0 + $0x3c] sm:$0x3]  ;;  %v196_v26 = vld [vmem:[#allocation0 + $0x1] ss:$8 sm:$0xf0]  }
  0x12   :  { %123 = vst [vmem:[#allocation0 + $0x40] sm:$0x3] %v289_v23  ;;  %8 = vst [vmem:[#allocation0 + $0xf8] sm:$0x3] %v266_v24  ;;  %v268_v27 = vld [vmem:[%s451_s0 + $0x3a] sm:$0x3] }
  0x13   :  { %13 = vst [vmem:[#allocation0 + $0xf0] sm:$0x3] %v267_v25  ;;  %v194_v28 = vld [vmem:[#allocation0 + $0x1] ss:$8 sm:$0xf]  }
  0x14   :  { %18 = vst [vmem:[#allocation0 + $0xe8] sm:$0x3] %v268_v27  ;;  %v269_v29 = vld [vmem:[%s451_s0 + $0x38] sm:$0x3]  ;;  %v198_v30 = vsel %vm162_vm0, %v196_v26, %v194_v28  ;;  %v270_v31 = vld [vmem:[%s451_s0 + $0x36] sm:$0x3] }
  0x15   :  { %23 = vst [vmem:[#allocation0 + $0xe0] sm:$0x3] %v269_v29  ;;  %v271_v32 = vld [vmem:[%s451_s0 + $0x34] sm:$0x3]  ;;  %v272_v33 = vld [vmem:[%s451_s0 + $0x32] sm:$0x3]  ;;  %199 = vrot.lane.b32.xlu0 %v198_v30, %s304_s10 }
  0x16   :  { %v217_v34 = vld [vmem:[#allocation0 + $0x81] ss:$8 sm:$0xf0]   ;;  %28 = vst [vmem:[#allocation0 + $0xd8] sm:$0x3] %v270_v31 }
  0x17   :  { %33 = vst [vmem:[#allocation0 + $0xd0] sm:$0x3] %v271_v32  ;;  %38 = vst [vmem:[#allocation0 + $0xc8] sm:$0x3] %v272_v33  ;;  %v273_v35 = vld [vmem:[%s451_s0 + $0x30] sm:$0x3] }
  0x18   :  { %v215_v36 = vld [vmem:[#allocation0 + $0x81] ss:$8 sm:$0xf]   ;;  %43 = vst [vmem:[#allocation0 + $0xc0] sm:$0x3] %v273_v35 }
  0x19   :  { %v160_v37 = vld [vmem:[#allocation0] ss:$8 sm:$0xf]   ;;  %v219_v38 = vsel %vm162_vm0, %v217_v34, %v215_v36  ;;  %v206_v39 = vld [vmem:[#allocation0 + $0x41] ss:$8 sm:$0xf0]  }
  0x1a   :  { %v161_v40 = vld [vmem:[#allocation0] ss:$8 sm:$0xf0]   ;;  %220 = vrot.lane.b32.xlu1 %v219_v38, %s304_s10  ;;  %v204_v44 = vld [vmem:[#allocation0 + $0x41] ss:$8 sm:$0xf]  }
  0x1b   :  { %v163_v41 = vsel %vm162_vm0, %v161_v40, %v160_v37  ;;  %v176_v42 = vld [vmem:[#allocation0 + $0x80] ss:$8 sm:$0xf]   ;;  %v208_v47 = vsel %vm162_vm0, %v206_v39, %v204_v44 }
  0x1c   :  { %v178_v43 = vld [vmem:[#allocation0 + $0x80] ss:$8 sm:$0xf0]   ;;  %165 = vst.msk [vmem:[%s452_s1] sm:$0xff] %vm164_vm1, %v163_v41   ;;  %209 = vrot.lane.b32.xlu0 %v208_v47, %s304_s10 }
  0x1d   :  { %v180_v45 = vsel %vm162_vm0, %v178_v43, %v176_v42  ;;  %v167_v46 = vld [vmem:[#allocation0 + $0x40] ss:$8 sm:$0xf]   ;;  %v228_v49 = vld [vmem:[#allocation0 + $0xc1] ss:$8 sm:$0xf0]  }
  0x1e   :  { %298 = vst.msk [vmem:[%s452_s1 + $0x10] sm:$0xff] %vm164_vm1, %v180_v45   ;;  %v169_v48 = vld [vmem:[#allocation0 + $0x40] ss:$8 sm:$0xf0]  }
  0x1f   :  { %v171_v50 = vsel %vm162_vm0, %v169_v48, %v167_v46  ;;  %v187_v51 = vld [vmem:[#allocation0 + $0xc0] ss:$8 sm:$0xf0]   ;;  %v226_v52 = vld [vmem:[#allocation0 + $0xc1] ss:$8 sm:$0xf]  }
  0x20   :  { %297 = vst.msk [vmem:[%s452_s1 + $0x8] sm:$0xff] %vm164_vm1, %v171_v50   ;;  %v185_v53 = vld [vmem:[#allocation0 + $0xc0] ss:$8 sm:$0xf]   ;;  %v230_v54 = vsel %vm162_vm0, %v228_v49, %v226_v52 }
  0x21   :  { %v189_v55 = vsel %vm162_vm0, %v187_v51, %v185_v53  ;;  %231 = vrot.lane.b32.xlu1 %v230_v54, %s304_s10 }
  0x22   :  { %299 = vst.msk [vmem:[%s452_s1 + $0x18] sm:$0xff] %vm164_vm1, %v189_v55  }
  0x87   :  { %v200_v56 = vpop.permute.xlu0 %199  }
  0x88   :  { %202 = vst.msk [vmem:[%s452_s1] sm:$0xff] %vm201_vm2, %v200_v56  }
  0x8c   :  { %v221_v57 = vpop.permute.xlu1 %220  }
  0x8d   :  { %301 = vst.msk [vmem:[%s452_s1 + $0x10] sm:$0xff] %vm201_vm2, %v221_v57  }
  0x8e   :  { %v210_v58 = vpop.permute.xlu0 %209  }
  0x8f   :  { %300 = vst.msk [vmem:[%s452_s1 + $0x8] sm:$0xff] %vm201_vm2, %v210_v58  }
  0x93   :  { %v232_v59 = vpop.permute.xlu1 %231  }
  0x94   :  { %302 = vst.msk [vmem:[%s452_s1 + $0x18] sm:$0xff] %vm201_vm2, %v232_v59  }

// kernel: mul.46
= control target key start
LH: loop header
LB: loop body
LE: loop exit
PB: predicated region body
PF: predicated region fallthrough
CT: control target
= control target key end

     0   :  { %vm82_vm0 = vcmask 1047556   ;;  %vm84_vm1 = vcmask 130048   ;;  %vm103_vm2 = vcmask 261248   ;;  %s225_s0 = inlined_call_operand.vmem [shape: f32[2,16,2,8], index: 0, kind: input, shape index: {}]   ;;  %s226_s1 = inlined_call_operand.vmem [shape: f32[32,16], index: 1, kind: output, shape index: {}]  }
   0x1   :  { %v138_v0 = vld [vmem:[%s225_s0 + $0xe] sm:$0x3]  ;;  %v139_v1 = vld [vmem:[%s225_s0 + $0xc] sm:$0x3]  ;;  %v140_v2 = vld [vmem:[%s225_s0 + $0xa] sm:$0x3] }
   0x2   :  { %48 = vst [vmem:[#allocation0 + $0x38] sm:$0x3] %v138_v0  ;;  %53 = vst [vmem:[#allocation0 + $0x30] sm:$0x3] %v139_v1  ;;  %v141_v3 = vld [vmem:[%s225_s0 + $0x8] sm:$0x3] }
   0x3   :  { %58 = vst [vmem:[#allocation0 + $0x28] sm:$0x3] %v140_v2  ;;  %v142_v4 = vld [vmem:[%s225_s0 + $0x6] sm:$0x3]  ;;  %v143_v5 = vld [vmem:[%s225_s0 + $0x4] sm:$0x3] }
   0x4   :  { %63 = vst [vmem:[#allocation0 + $0x20] sm:$0x3] %v141_v3  ;;  %68 = vst [vmem:[#allocation0 + $0x18] sm:$0x3] %v142_v4  ;;  %v144_v6 = vld [vmem:[%s225_s0 + $0x2] sm:$0x3] }
   0x5   :  { %73 = vst [vmem:[#allocation0 + $0x10] sm:$0x3] %v143_v5  ;;  %v78_v7 = vld [vmem:[%s225_s0] sm:$0x3]  ;;  %77 = vst [vmem:[#allocation0 + $0x8] sm:$0x3] %v144_v6 }
   0x6   :  { %79 = vst [vmem:[#allocation0] sm:$0x3] %v78_v7  ;;  %v130_v8 = vld [vmem:[%s225_s0 + $0x1e] sm:$0x3]  ;;  %v131_v9 = vld [vmem:[%s225_s0 + $0x1c] sm:$0x3] }
   0x7   :  { %v132_v10 = vld [vmem:[%s225_s0 + $0x1a] sm:$0x3]  ;;  %8 = vst [vmem:[#allocation0 + $0x78] sm:$0x3] %v130_v8  ;;  %13 = vst [vmem:[#allocation0 + $0x70] sm:$0x3] %v131_v9 }
   0x8   :  { %18 = vst [vmem:[#allocation0 + $0x68] sm:$0x3] %v132_v10  ;;  %v133_v11 = vld [vmem:[%s225_s0 + $0x18] sm:$0x3]  ;;  %v134_v12 = vld [vmem:[%s225_s0 + $0x16] sm:$0x3] }
   0x9   :  { %v135_v13 = vld [vmem:[%s225_s0 + $0x14] sm:$0x3]  ;;  %23 = vst [vmem:[#allocation0 + $0x60] sm:$0x3] %v133_v11  ;;  %28 = vst [vmem:[#allocation0 + $0x58] sm:$0x3] %v134_v12 }
   0xa   :  { %33 = vst [vmem:[#allocation0 + $0x50] sm:$0x3] %v135_v13  ;;  %v136_v14 = vld [vmem:[%s225_s0 + $0x12] sm:$0x3]  ;;  %v137_v15 = vld [vmem:[%s225_s0 + $0x10] sm:$0x3] }
   0xb   :  { %38 = vst [vmem:[#allocation0 + $0x48] sm:$0x3] %v136_v14  ;;  %43 = vst [vmem:[#allocation0 + $0x40] sm:$0x3] %v137_v15  ;;  %s148_s0 = smov 16  }
   0xc   :  { %v98_v16 = vld [vmem:[#allocation0 + $0x1] ss:$8 sm:$0xf0]   ;;  %v81_v17 = vld [vmem:[#allocation0] ss:$8 sm:$0xf0]  }
   0xd   :  { %v96_v18 = vld [vmem:[#allocation0 + $0x1] ss:$8 sm:$0xf]   ;;  %v80_v19 = vld [vmem:[#allocation0] ss:$8 sm:$0xf]  }
   0xe   :  { %v100_v20 = vsel %vm82_vm0, %v98_v16, %v96_v18  ;;  %v83_v21 = vsel %vm82_vm0, %v81_v17, %v80_v19 }
   0xf   :  { %101 = vrot.lane.b32.xlu0 %v100_v20, %s148_s0  ;;  %85 = vst.msk [vmem:[%s226_s1] sm:$0xff] %vm84_vm1, %v83_v21  }
  0x10   :  { %v108_v22 = vld [vmem:[#allocation0 + $0x41] ss:$8 sm:$0xf0]   ;;  %v89_v23 = vld [vmem:[#allocation0 + $0x40] ss:$8 sm:$0xf0]  }
  0x12   :  { %v106_v24 = vld [vmem:[#allocation0 + $0x41] ss:$8 sm:$0xf]   ;;  %v87_v25 = vld [vmem:[#allocation0 + $0x40] ss:$8 sm:$0xf]  }
  0x13   :  { %v110_v26 = vsel %vm82_vm0, %v108_v22, %v106_v24  ;;  %v91_v27 = vsel %vm82_vm0, %v89_v23, %v87_v25 }
  0x14   :  { %145 = vst.msk [vmem:[%s226_s1 + $0x8] sm:$0xff] %vm84_vm1, %v91_v27   ;;  %111 = vrot.lane.b32.xlu0 %v110_v26, %s148_s0 }
  0x81   :  { %v102_v28 = vpop.permute.xlu0 %101  }
  0x82   :  { %104 = vst.msk [vmem:[%s226_s1] sm:$0xff] %vm103_vm2, %v102_v28  }
  0x86   :  { %v112_v29 = vpop.permute.xlu0 %111  }
  0x87   :  { %146 = vst.msk [vmem:[%s226_s1 + $0x8] sm:$0xff] %vm103_vm2, %v112_v29  }

// kernel: mul.88
= control target key start
LH: loop header
LB: loop body
LE: loop exit
PB: predicated region body
PF: predicated region fallthrough
CT: control target
= control target key end

     0   :  { %vm42_vm0 = vcmask 1047556   ;;  %vm44_vm1 = vcmask 64512   ;;  %vm54_vm2 = vcmask 130112   ;;  %s111_s0 = inlined_call_operand.vmem [shape: f32[2,8,2,4], index: 0, kind: input, shape index: {}]   ;;  %s112_s1 = inlined_call_operand.vmem [shape: f32[16,8], index: 1, kind: output, shape index: {}]  }
   0x1   :  { %v62_v0 = vld [vmem:[%s111_s0 + $0xe] sm:$0x3]  ;;  %v63_v1 = vld [vmem:[%s111_s0 + $0xc] sm:$0x3]  ;;  %v64_v2 = vld [vmem:[%s111_s0 + $0xa] sm:$0x3] }
   0x2   :  { %8 = vst [vmem:[#allocation0 + $0x38] sm:$0x3] %v62_v0  ;;  %13 = vst [vmem:[#allocation0 + $0x30] sm:$0x3] %v63_v1  ;;  %v65_v3 = vld [vmem:[%s111_s0 + $0x8] sm:$0x3] }
   0x3   :  { %18 = vst [vmem:[#allocation0 + $0x28] sm:$0x3] %v64_v2  ;;  %v66_v4 = vld [vmem:[%s111_s0 + $0x6] sm:$0x3]  ;;  %v67_v5 = vld [vmem:[%s111_s0 + $0x4] sm:$0x3] }
   0x4   :  { %23 = vst [vmem:[#allocation0 + $0x20] sm:$0x3] %v65_v3  ;;  %28 = vst [vmem:[#allocation0 + $0x18] sm:$0x3] %v66_v4  ;;  %v68_v6 = vld [vmem:[%s111_s0 + $0x2] sm:$0x3] }
   0x5   :  { %33 = vst [vmem:[#allocation0 + $0x10] sm:$0x3] %v67_v5  ;;  %v38_v7 = vld [vmem:[%s111_s0] sm:$0x3]  ;;  %37 = vst [vmem:[#allocation0 + $0x8] sm:$0x3] %v68_v6 }
   0x6   :  { %39 = vst [vmem:[#allocation0] sm:$0x3] %v38_v7  ;;  %s70_s0 = smov 8  }
   0xb   :  { %v41_v8 = vld [vmem:[#allocation0] ss:$8 sm:$0xf0]   ;;  %v49_v9 = vld [vmem:[#allocation0 + $0x1] ss:$8 sm:$0xf0]  }
   0xd   :  { %v40_v10 = vld [vmem:[#allocation0] ss:$8 sm:$0xf]   ;;  %v47_v11 = vld [vmem:[#allocation0 + $0x1] ss:$8 sm:$0xf]  }
   0xe   :  { %v43_v12 = vsel %vm42_vm0, %v41_v8, %v40_v10  ;;  %v51_v13 = vsel %vm42_vm0, %v49_v9, %v47_v11 }
   0xf   :  { %52 = vrot.lane.b32.xlu0 %v51_v13, %s70_s0  ;;  %45 = vst.msk [vmem:[%s112_s1] sm:$0xff] %vm44_vm1, %v43_v12  }
  0x81   :  { %v53_v14 = vpop.permute.xlu0 %52  }
  0x82   :  { %55 = vst.msk [vmem:[%s112_s1] sm:$0xff] %vm54_vm2, %v53_v14  }

// kernel: mul.109
= control target key start
LH: loop header
LB: loop body
LE: loop exit
PB: predicated region body
PF: predicated region fallthrough
CT: control target
= control target key end

     0   :  { %vm21_vm0 = vcmask 31744   ;;  %vm27_vm1 = vcmask 64544   ;;  %s67_s0 = inlined_call_operand.vmem [shape: f32[2,4,2,2], index: 0, kind: input, shape index: {}]   ;;  %s68_s1 = inlined_call_operand.vmem [shape: f32[8,4], index: 1, kind: output, shape index: {}]  }
   0x1   :  { %v37_v0 = vld [vmem:[%s67_s0 + $0x6] sm:$0x3]  ;;  %v38_v1 = vld [vmem:[%s67_s0 + $0x4] sm:$0x3]  ;;  %v39_v2 = vld [vmem:[%s67_s0 + $0x2] sm:$0x3] }
   0x2   :  { %8 = vst [vmem:[#allocation1 + $0x18] sm:$0x3] %v37_v0  ;;  %13 = vst [vmem:[#allocation1 + $0x10] sm:$0x3] %v38_v1  ;;  %v18_v3 = vld [vmem:[%s67_s0] sm:$0x3] }
   0x3   :  { %17 = vst [vmem:[#allocation1 + $0x8] sm:$0x3] %v39_v2  ;;  %19 = vst [vmem:[#allocation1] sm:$0x3] %v18_v3  ;;  %s41_s0 = smov 4  }
   0xa   :  { %v24_v4 = vld [vmem:[#allocation1 + $0x1] ss:$8 sm:$0xf]   ;;  %v20_v5 = vld [vmem:[#allocation1] ss:$8 sm:$0xf]  }
   0xb   :  { %25 = vrot.lane.b32.xlu0 %v24_v4, %s41_s0  ;;  %22 = vst.msk [vmem:[#allocation0] sm:$0xf] %vm21_vm0, %v20_v5  }
  0x7d   :  { %v26_v6 = vpop.permute.xlu0 %25  }
  0x7e   :  { %28 = vst.msk [vmem:[#allocation0] sm:$0xf] %vm27_vm1, %v26_v6  }
  0x85   :  { %v32_v7 = vld [vmem:[#allocation0] sm:$0xf] }
  0x86   :  { %34 = vst [vmem:[%s68_s1] sm:$0xf] %v32_v7 }

// kernel: mul.130
= control target key start
LH: loop header
LB: loop body
LE: loop exit
PB: predicated region body
PF: predicated region fallthrough
CT: control target
= control target key end

     0   :  { %s10_s10 = smov 3  ;;  %vm12_vm0 = vcmask 15360   ;;  %s29_s11 = smov 2   ;;  %vm19_vm1 = vcmask 31760   ;;  %s49_s0 = inlined_call_operand.vmem [shape: f32[2,2,2,1], index: 0, kind: input, shape index: {}]   ;;  %s50_s1 = inlined_call_operand.vmem [shape: f32[4,2], index: 1, kind: output, shape index: {}]  }
   0x1   :  { %v27_v0 = vld [vmem:[%s49_s0 + $0x2] sm:$0x3]  ;;  %v8_v1 = vld [vmem:[%s49_s0] sm:$0x3]  ;;  %s15_s0 = smov 3 }
   0x2   :  { %7 = vst [vmem:[#allocation1 + $0x8] sm:$0x3] %v27_v0  ;;  %9 = vst [vmem:[#allocation1] sm:$0x3] %v8_v1 }
   0x9   :  { %v16_v2 = vld [vmem:[#allocation1 + $0x1] ss:$8 sm:%s15_s0]   ;;  %v11_v3 = vld [vmem:[#allocation1] ss:$8 sm:%s10_s10]  }
   0xa   :  { %17 = vrot.lane.b32.xlu0 %v16_v2, %s29_s11  ;;  %13 = vst.msk [vmem:[#allocation0] sm:$0x3] %vm12_vm0, %v11_v3  }
  0x7c   :  { %v18_v4 = vpop.permute.xlu0 %17  }
  0x7d   :  { %20 = vst.msk [vmem:[#allocation0] sm:$0x3] %vm19_vm1, %v18_v4  }
  0x84   :  { %v24_v5 = vld [vmem:[#allocation0] sm:$0x3] }
  0x85   :  { %26 = vst [vmem:[%s50_s1] sm:$0x3] %v24_v5 }

// kernel: affine_generator_forward.1
= control target key start
LH: loop header
LB: loop body
LE: loop exit
PB: predicated region body
PF: predicated region fallthrough
CT: control target
= control target key end

     0   :  { %vm70_vm0 = vcmask 261120   ;;  %vm2955_vm1 = vmmov 0   ;;  %vm477_vm2 = vcmask 130048   ;;  %vm584_vm3 = vcmask 523264   ;;  %s2972_s21 = smov 14   ;;  %s3566_s0 = inlined_call_operand.vmem [shape: f32[32,128], index: 0, kind: input, shape index: {}]   ;;  %s3567_s1 = inlined_call_operand.vmem [shape: f32[48,32], index: 1, kind: input, shape index: {}]   ;;  %s3568_s2 = inlined_call_operand.vmem [shape: f32[3,128,64], index: 2, kind: input, shape index: {}]   ;;  %s3569_s3 = inlined_call_operand.vmem [shape: f32[1,64], index: 3, kind: input, shape index: {}]   ;;  %s3570_s5 = inlined_call_operand.vmem [shape: f32[3,64,32], index: 5, kind: input, shape index: {}]   ;;  %s3571_s4 = inlined_call_operand.vmem [shape: f32[24,16], index: 4, kind: input, shape index: {}]   ;;  %s3572_s7 = inlined_call_operand.vmem [shape: f32[12,8], index: 7, kind: input, shape index: {}]   ;;  %s3573_s6 = inlined_call_operand.vmem [shape: f32[1,32], index: 6, kind: input, shape index: {}]   ;;  %s3574_s8 = inlined_call_operand.vmem [shape: f32[3,32,16], index: 8, kind: input, shape index: {}]   ;;  %s3575_s9 = inlined_call_operand.vmem [shape: f32[1,16], index: 9, kind: input, shape index: {}]   ;;  %s3576_s10 = inlined_call_operand.vmem [shape: f32[6,4], index: 10, kind: input, shape index: {}]   ;;  %s3577_s11 = inlined_call_operand.vmem [shape: f32[3,16,8], index: 11, kind: input, shape index: {}]   ;;  %s3578_s12 = inlined_call_operand.vmem [shape: f32[1,8], index: 12, kind: input, shape index: {}]   ;;  %s3579_s13 = inlined_call_operand.vmem [shape: f32[3,2], index: 13, kind: input, shape index: {}]   ;;  %s3580_s14 = inlined_call_operand.vmem [shape: f32[3,8,4], index: 14, kind: input, shape index: {}]   ;;  %s3581_s16 = inlined_call_operand.vmem [shape: f32[4,18], index: 16, kind: input, shape index: {}]   ;;  %s3582_s15 = inlined_call_operand.vmem [shape: f32[1,4], index: 15, kind: input, shape index: {}]   ;;  %s3583_s17 = inlined_call_operand.vmem [shape: f32[1,18], index: 17, kind: input, shape index: {}]   ;;  %s3584_s18 = inlined_call_operand.vmem [shape: f32[1,18], index: 18, kind: output, shape index: {}]  }
   0x1   :  { %3588 = sst [smem:[#allocation2_spill]] %s3566_s0  ;;  %vm826_vm4 = vcmask 64512   ;;  %vm1157_vm5 = vcmask 1043456   ;;  %vm1153_vm6 = vcmask 31744   ;;  %vm1474_vm7 = vcmask 1041408  }
   0x2   :  { %3589 = sst [smem:[#allocation3_spill]] %s3567_s1  ;;  %s3591_s29 = sld [smem:[#allocation2_spill]]  ;;  %vm1470_vm8 = vcmask 15360  }
   0x3   :  { %3590 = sst [smem:[#allocation4_spill]] %s3568_s2  ;;  %s3592_s23 = sld [smem:[#allocation3_spill]] }
   0x4   :  { %s3593_s26 = sld [smem:[#allocation4_spill]] }
   0x8   :  { %v59_v0 = vld [vmem:[%s3591_s29] sm:$0xff]  ;;  %v60_v1 = vld [vmem:[%s3591_s29 + $0x8] sm:$0xff]  ;;  %v61_v2 = vld [vmem:[%s3591_s29 + $0x10] sm:$0xff] }
   0x9   :  { %v2739_v3 = vpack.c.bf16 %v60_v1, %v59_v0  ;;  %v62_v4 = vld [vmem:[%s3591_s29 + $0x18] sm:$0xff]  ;;  %v63_v5 = vld [vmem:[%s3592_s23] sm:$0xff]  ;;  %v64_v15 = vld [vmem:[%s3592_s23 + $0x8] sm:$0xff] }
   0xa   :  { %v2743_v6 = vpack.c.bf16 %v62_v4, %v61_v2  ;;  %2466 = vmatprep.mubr.msk.f32.mxu0 %vm70_vm0, %v63_v5  ;;  %v2226_v7 = vld [vmem:[%s3593_s26 + $0x80] sm:$0xff]  ;;  %v2227_v8 = vld [vmem:[%s3593_s26 + $0x88] sm:$0xff]  ;;  %v2228_v10 = vld [vmem:[%s3593_s26 + $0x90] sm:$0xff] }
   0xb   :  { %2740 = vmatprep.subr.bf16.mxu0 %v2739_v3  ;;  %v2747_v9 = vpack.c.bf16 %v2227_v8, %v2226_v7  ;;  %v2229_v11 = vld [vmem:[%s3593_s26 + $0x98] sm:$0xff]  ;;  %v2230_v13 = vld [vmem:[%s3593_s26 + $0xa0] sm:$0xff]  ;;  %v2231_v14 = vld [vmem:[%s3593_s26 + $0xa8] sm:$0xff] }
   0xc   :  { %2742 = vmatpush3.bf16.msra.mxu0 %v2739_v3  ;;  %v2751_v12 = vpack.c.bf16 %v2229_v11, %v2228_v10  ;;  %v2755_v16 = vpack.c.bf16 %v2231_v14, %v2230_v13  ;;  %v65_v17 = vld [vmem:[%s3592_s23 + $0x10] sm:$0xff]  ;;  %v2233_v19 = vld [vmem:[%s3593_s26 + $0xb8] sm:$0xff]  ;;  %v67_v22 = vld [vmem:[%s3592_s23 + $0x20] sm:$0xff] }
   0xd   :  { %2744 = vmatprep.subr.bf16.mxu0 %v2743_v6  ;;  %2748 = vmatprep.subr.bf16.mxu1 %v2747_v9  ;;  %v2232_v18 = vld [vmem:[%s3593_s26 + $0xb0] sm:$0xff]  ;;  %v66_v20 = vld [vmem:[%s3592_s23 + $0x18] sm:$0xff]  ;;  %v2234_v23 = vld [vmem:[%s3593_s26 + $0xc0] sm:$0xff] }
   0xe   :  { %2750 = vmatpush3.bf16.msra.mxu1 %v2747_v9  ;;  %v2759_v21 = vpack.c.bf16 %v2233_v19, %v2232_v18  ;;  %v2235_v24 = vld [vmem:[%s3593_s26 + $0xc8] sm:$0xff]  ;;  %v2236_v27 = vld [vmem:[%s3593_s26 + $0xd0] sm:$0xff]  ;;  %v2237_v28 = vld [vmem:[%s3593_s26 + $0xd8] sm:$0xff] }
   0xf   :  { %2752 = vmatprep.subr.bf16.mxu1 %v2751_v12  ;;  %v68_v25 = vld [vmem:[%s3592_s23 + $0x28] sm:$0xff]  ;;  %v2763_v26 = vpack.c.bf16 %v2235_v24, %v2234_v23  ;;  %v2767_v29 = vpack.c.bf16 %v2237_v28, %v2236_v27  ;;  %v2238_v30 = vld [vmem:[%s3593_s26 + $0xe0] sm:$0xff]  ;;  %v2240_v33 = vld [vmem:[%s3593_s26 + $0xf0] sm:$0xff]  ;;  %v2956_v27 = vmov 0.0   ;;  %s2963_s23 = smov 125  }
  0x10   :  { %2746 = vmatpush3.bf16.msra.mxu0 %v2743_v6  ;;  %v2239_v31 = vld [vmem:[%s3593_s26 + $0xe8] sm:$0xff]  ;;  %v2241_v34 = vld [vmem:[%s3593_s26 + $0xf8] sm:$0xff]  ;;  %v184_v36 = vld [vmem:[%s3593_s26] sm:$0xff] }
  0x11   :  { %v2771_v32 = vpack.c.bf16 %v2239_v31, %v2238_v30  ;;  %v2775_v35 = vpack.c.bf16 %v2241_v34, %v2240_v33  ;;  %v185_v37 = vld [vmem:[%s3593_s26 + $0x8] sm:$0xff]  ;;  %v186_v41 = vld [vmem:[%s3593_s26 + $0x10] sm:$0xff]  ;;  %v187_v42 = vld [vmem:[%s3593_s26 + $0x18] sm:$0xff] }
  0x12   :  { %2754 = vmatpush3.bf16.msra.mxu1 %v2751_v12  ;;  %v2779_v38 = vpack.c.bf16 %v185_v37, %v184_v36  ;;  %v2783_v45 = vpack.c.bf16 %v187_v42, %v186_v41  ;;  %v188_v46 = vld [vmem:[%s3593_s26 + $0x20] sm:$0xff]  ;;  %v189_v47 = vld [vmem:[%s3593_s26 + $0x28] sm:$0xff]  ;;  %v190_v51 = vld [vmem:[%s3593_s26 + $0x30] sm:$0xff] }
  0x13   :  { %2467 = vmatmul.mubr.msk.f32.vlgmr.msra.gmra.mrb[0].mxu0 %vm70_vm0, %v64_v15  ;;  %2756 = vmatprep.subr.bf16.mxu1 %v2755_v16  ;;  %v2787_v49 = vpack.c.bf16 %v189_v47, %v188_v46  ;;  %v191_v52 = vld [vmem:[%s3593_s26 + $0x38] sm:$0xff]  ;;  %v192_v54 = vld [vmem:[%s3593_s26 + $0x40] sm:$0xff]  ;;  %v193_v55 = vld [vmem:[%s3593_s26 + $0x48] sm:$0xff] }
  0x14   :  { %2469 = vmatprep.mubr.msk.f32.mxu0 %vm70_vm0, %v65_v17  ;;  %v2791_v53 = vpack.c.bf16 %v191_v52, %v190_v51  ;;  %v2795_v56 = vpack.c.bf16 %v193_v55, %v192_v54  ;;  %v194_v57 = vld [vmem:[%s3593_s26 + $0x50] sm:$0xff]  ;;  %v195_v58 = vld [vmem:[%s3593_s26 + $0x58] sm:$0xff]  ;;  %v196_v60 = vld [vmem:[%s3593_s26 + $0x60] sm:$0xff] }
  0x15   :  { %v2799_v59 = vpack.c.bf16 %v195_v58, %v194_v57  ;;  %v197_v61 = vld [vmem:[%s3593_s26 + $0x68] sm:$0xff]  ;;  %v198_v63 = vld [vmem:[%s3593_s26 + $0x70] sm:$0xff]  ;;  %v199_v0 = vld [vmem:[%s3593_s26 + $0x78] sm:$0xff] }
  0x16   :  { %2758 = vmatpush3.bf16.msra.mxu1 %v2755_v16  ;;  %v2803_v62 = vpack.c.bf16 %v197_v61, %v196_v60  ;;  %v2807_v1 = vpack.c.bf16 %v199_v0, %v198_v63  ;;  %v2242_v2 = vld [vmem:[%s3593_s26 + $0x100] sm:$0xff]  ;;  %v2243_v3 = vld [vmem:[%s3593_s26 + $0x108] sm:$0xff]  ;;  %v2244_v5 = vld [vmem:[%s3593_s26 + $0x110] sm:$0xff] }
  0x17   :  { %2470 = vmatmul.mubr.msk.f32.gmra.mrb[2].mxu0 %vm70_vm0, %v66_v20  ;;  %2760 = vmatprep.subr.bf16.mxu1 %v2759_v21  ;;  %v2811_v4 = vpack.c.bf16 %v2243_v3, %v2242_v2  ;;  %v2245_v6 = vld [vmem:[%s3593_s26 + $0x118] sm:$0xff]  ;;  %v2246_v8 = vld [vmem:[%s3593_s26 + $0x120] sm:$0xff]  ;;  %v2247_v9 = vld [vmem:[%s3593_s26 + $0x128] sm:$0xff] }
  0x18   :  { %2472 = vmatprep.mubr.msk.f32.mxu0 %vm70_vm0, %v67_v22  ;;  %v2815_v7 = vpack.c.bf16 %v2245_v6, %v2244_v5  ;;  %v2819_v10 = vpack.c.bf16 %v2247_v9, %v2246_v8  ;;  %v2248_v11 = vld [vmem:[%s3593_s26 + $0x130] sm:$0xff]  ;;  %v2249_v12 = vld [vmem:[%s3593_s26 + $0x138] sm:$0xff]  ;;  %v2250_v14 = vld [vmem:[%s3593_s26 + $0x140] sm:$0xff] }
  0x19   :  { %v2823_v13 = vpack.c.bf16 %v2249_v12, %v2248_v11  ;;  %v2251_v15 = vld [vmem:[%s3593_s26 + $0x148] sm:$0xff]  ;;  %v2252_v17 = vld [vmem:[%s3593_s26 + $0x150] sm:$0xff]  ;;  %v2253_v18 = vld [vmem:[%s3593_s26 + $0x158] sm:$0xff] }
  0x1a   :  { %2762 = vmatpush3.bf16.msra.mxu1 %v2759_v21  ;;  %v2827_v16 = vpack.c.bf16 %v2251_v15, %v2250_v14  ;;  %v2831_v19 = vpack.c.bf16 %v2253_v18, %v2252_v17  ;;  %v2254_v20 = vld [vmem:[%s3593_s26 + $0x160] sm:$0xff]  ;;  %v2255_v21 = vld [vmem:[%s3593_s26 + $0x168] sm:$0xff]  ;;  %v2256_v23 = vld [vmem:[%s3593_s26 + $0x170] sm:$0xff] }
  0x1b   :  { %2473 = vmatmul.mubr.msk.f32.gmra.mrb[4].mxu0 %vm70_vm0, %v68_v25  ;;  %2764 = vmatprep.subr.bf16.mxu1 %v2763_v26  ;;  %v2835_v22 = vpack.c.bf16 %v2255_v21, %v2254_v20  ;;  %v2257_v24 = vld [vmem:[%s3593_s26 + $0x178] sm:$0xff]  ;;  %v2258_v28 = vld [vmem:[%s3569_s3] ss:$0 sm:$0xff]  ;;  %v2264_v42 = vld [vmem:[%s3570_s5 + $0x50] sm:$0xff]  ;;  %s2960_s26 = smov 126  }
  0x1c   :  { %v2839_v25 = vpack.c.bf16 %v2257_v24, %v2256_v23  ;;  %2584 = vmatprep.mubr.msk.f32.mxu0 %vm2955_vm1, %v2956_v27  ;;  %v2262_v37 = vld [vmem:[%s3570_s5 + $0x40] sm:$0xff]  ;;  %v2267_v47 = vld [vmem:[%s3570_s5 + $0x68] sm:$0xff]  ;;  %v2269_v51 = vld [vmem:[%s3570_s5 + $0x78] sm:$0xff] }
  0x1d   :  { %v2266_v46 = vld [vmem:[%s3570_s5 + $0x60] sm:$0xff]  ;;  %v568_v54 = vld [vmem:[%s3570_s5 + $0x8] sm:$0xff]  ;;  %v569_v58 = vld [vmem:[%s3570_s5 + $0x10] sm:$0xff] }
  0x1e   :  { %2766 = vmatpush3.bf16.msra.mxu1 %v2763_v26  ;;  %v2954_v26 = vmov 0.0|0.0   ;;  %v571_v63 = vld [vmem:[%s3570_s5 + $0x20] sm:$0xff]  ;;  %v572_v0 = vld [vmem:[%s3570_s5 + $0x28] sm:$0xff]  ;;  %v574_v5 = vld [vmem:[%s3570_s5 + $0x38] sm:$0xff] }
  0x1f   :  { %2768 = vmatprep.subr.bf16.mxu1 %v2767_v29  ;;  %2843 = vmatprep.subr.bf16.mxu0 %v2954_v26  ;;  %v2865_v3 = vpack.c.bf16 %v572_v0, %v571_v63  ;;  %v2273_v8 = vld [vmem:[%s3570_s5 + $0x88] sm:$0xff]  ;;  %v2275_v11 = vld [vmem:[%s3570_s5 + $0x98] sm:$0xff] }
  0x20   :  { %v2277_v14 = vld [vmem:[%s3570_s5 + $0xa8] sm:$0xff]  ;;  %v2279_v17 = vld [vmem:[%s3570_s5 + $0xb8] sm:$0xff] }
  0x22   :  { %2770 = vmatpush3.bf16.msra.mxu1 %v2767_v29 }
  0x23   :  { %2772 = vmatprep.subr.bf16.mxu1 %v2771_v32 }
  0x26   :  { %2774 = vmatpush3.bf16.msra.mxu1 %v2771_v32 }
  0x27   :  { %2776 = vmatprep.subr.bf16.mxu1 %v2775_v35 }
  0x2a   :  { %2778 = vmatpush3.bf16.msra.mxu1 %v2775_v35 }
  0x2b   :  { %2780 = vmatprep.subr.bf16.mxu1 %v2779_v38 }
  0xe6   :  { %v2468_v39 = vpop.f32.mrb[0].mxu0 }
  0xe7   :  { %v155_v40 = vpop.f32.mrb[1].mxu0 }
  0xea   :  { %v2471_v43 = vpop.f32.mrb[2].mxu0 }
  0xeb   :  { %v165_v44 = vpop.f32.mrb[3].mxu0 }
  0xec   :  { %2507 = vmatprep.mubr.f32.mxu1 %v165_v44  ;;  %v474_v44 = vld [vmem:[%s3571_s4 + $0x8] sm:$0xff] }
  0xed   :  { %2508 = vmatmul.mubr.f32.vlgmr.msra.gmra.mrb[0].mxu1 %v2471_v43  ;;  %v2265_v43 = vld [vmem:[%s3570_s5 + $0x58] sm:$0xff] }
  0xee   :  { %2782 = vmatpush3.bf16.msra.mxu1 %v2779_v38  ;;  %2542 = vmatprep.mubr.f32.mxu1 %v155_v40  ;;  %v3174_v48 = vpop.f32.mrb[4].mxu0  ;;  %v2263_v38 = vld [vmem:[%s3570_s5 + $0x48] sm:$0xff]  ;;  %v473_v40 = vld [vmem:[%s3571_s4] sm:$0xff] }
  0xef   :  { %2784 = vmatprep.subr.bf16.mxu1 %v2783_v45  ;;  %v175_v50 = vpop.f32.mrb[5].mxu0  ;;  %v2847_v41 = vpack.c.bf16 %v2263_v38, %v2262_v37  ;;  %v2286_v38 = vld [vmem:[%s3574_s8 + $0x30] sm:$0xff] }
  0xf2   :  { %2786 = vmatpush3.bf16.msra.mxu1 %v2783_v45  ;;  %v2850_v45 = vpack.c.bf16 %v2265_v43, %v2264_v42  ;;  %v909_v42 = vld [vmem:[%s3574_s8 + $0x8] sm:$0xff] }
  0xf3   :  { %2788 = vmatprep.subr.bf16.mxu1 %v2787_v49 }
  0xf6   :  { %2790 = vmatpush3.bf16.msra.mxu1 %v2787_v49  ;;  %v2853_v49 = vpack.c.bf16 %v2267_v47, %v2266_v46  ;;  %v910_v47 = vld [vmem:[%s3574_s8 + $0x10] sm:$0xff] }
  0xf7   :  { %2792 = vmatprep.subr.bf16.mxu1 %v2791_v53 }
  0xfa   :  { %2794 = vmatpush3.bf16.msra.mxu1 %v2791_v53  ;;  %v567_v53 = vld [vmem:[%s3570_s5] sm:$0xff] }
  0xfb   :  { %2796 = vmatprep.subr.bf16.mxu1 %v2795_v56  ;;  %v2859_v57 = vpack.c.bf16 %v568_v54, %v567_v53  ;;  %v2292_v53 = vld [vmem:[%s3574_s8 + $0x50] sm:$0xff]  ;;  %v2293_v54 = vld [vmem:[%s3574_s8 + $0x58] sm:$0xff] }
  0xfe   :  { %2798 = vmatpush3.bf16.msra.mxu1 %v2795_v56 }
  0xff   :  { %2800 = vmatprep.subr.bf16.mxu1 %v2799_v59 }
 0x102   :  { %2802 = vmatpush3.bf16.msra.mxu1 %v2799_v59  ;;  %v570_v59 = vld [vmem:[%s3570_s5 + $0x18] sm:$0xff] }
 0x103   :  { %2804 = vmatprep.subr.bf16.mxu1 %v2803_v62 }
 0x106   :  { %2806 = vmatpush3.bf16.msra.mxu1 %v2803_v62  ;;  %v2862_v62 = vpack.c.bf16 %v570_v59, %v569_v58 }
 0x107   :  { %2808 = vmatprep.subr.bf16.mxu1 %v2807_v1 }
 0x10a   :  { %2810 = vmatpush3.bf16.msra.mxu1 %v2807_v1 }
 0x10b   :  { %2812 = vmatprep.subr.bf16.mxu1 %v2811_v4 }
 0x10d   :  { %2543 = vmatmul.mubr.f32.vlgmr.msra.gmra.mrb[0].mxu1 %v2468_v39 }
 0x10e   :  { %2814 = vmatpush3.bf16.msra.mxu1 %v2811_v4  ;;  %2577 = vmatprep.mubr.f32.mxu1 %v175_v50  ;;  %v2268_v50 = vld [vmem:[%s3570_s5 + $0x70] sm:$0xff] }
 0x10f   :  { %2816 = vmatprep.subr.bf16.mxu1 %v2815_v7  ;;  %v2856_v52 = vpack.c.bf16 %v2269_v51, %v2268_v50  ;;  %v573_v4 = vld [vmem:[%s3570_s5 + $0x30] sm:$0xff]  ;;  %v2290_v50 = vld [vmem:[%s3574_s8 + $0x40] sm:$0xff]  ;;  %v2291_v51 = vld [vmem:[%s3574_s8 + $0x48] sm:$0xff] }
 0x110   :  { %v2868_v6 = vpack.c.bf16 %v574_v5, %v573_v4  ;;  %v1151_v4 = vld [vmem:[%s3576_s10] sm:$0x3f]  ;;  %s2970_s10 = smov 6  }
 0x111   :  { %v1231_v5 = vld [vmem:[%s3577_s11] sm:$0xff] }
 0x112   :  { %2818 = vmatpush3.bf16.msra.mxu1 %v2815_v7  ;;  %v2272_v7 = vld [vmem:[%s3570_s5 + $0x80] sm:$0xff] }
 0x113   :  { %2820 = vmatprep.subr.bf16.mxu1 %v2819_v10  ;;  %v2871_v9 = vpack.c.bf16 %v2273_v8, %v2272_v7  ;;  %v2298_v8 = vld [vmem:[%s3577_s11 + $0x10] sm:$0xff] }
 0x116   :  { %2822 = vmatpush3.bf16.msra.mxu1 %v2819_v10  ;;  %v2274_v10 = vld [vmem:[%s3570_s5 + $0x90] sm:$0xff] }
 0x117   :  { %2824 = vmatprep.subr.bf16.mxu1 %v2823_v13  ;;  %v2874_v12 = vpack.c.bf16 %v2275_v11, %v2274_v10  ;;  %v2302_v11 = vld [vmem:[%s3577_s11 + $0x20] sm:$0xff] }
 0x11a   :  { %2826 = vmatpush3.bf16.msra.mxu1 %v2823_v13  ;;  %v2276_v13 = vld [vmem:[%s3570_s5 + $0xa0] sm:$0xff] }
 0x11b   :  { %2828 = vmatprep.subr.bf16.mxu1 %v2827_v16  ;;  %v2877_v15 = vpack.c.bf16 %v2277_v14, %v2276_v13 }
 0x11e   :  { %2830 = vmatpush3.bf16.msra.mxu1 %v2827_v16  ;;  %v2278_v16 = vld [vmem:[%s3570_s5 + $0xb0] sm:$0xff] }
 0x11f   :  { %2832 = vmatprep.subr.bf16.mxu1 %v2831_v19  ;;  %v2880_v18 = vpack.c.bf16 %v2279_v17, %v2278_v16 }
 0x122   :  { %2834 = vmatpush3.bf16.msra.mxu1 %v2831_v19  ;;  %v823_v19 = vld [vmem:[%s3572_s7] sm:$0xff] }
 0x123   :  { %2836 = vmatprep.subr.bf16.mxu1 %v2835_v22 }
 0x126   :  { %2838 = vmatpush3.bf16.msra.mxu1 %v2835_v22 }
 0x127   :  { %2840 = vmatprep.subr.bf16.mxu1 %v2839_v25 }
 0x12a   :  { %2842 = vmatpush3.bf16.msra.mxu1 %v2839_v25  ;;  %v2281_v25 = vld [vmem:[%s3573_s6] ss:$0 sm:$0xff] }
 0x12b   :  { %2900 = vmatprep.subr.bf16.mxu1 %v2954_v26 }
 0x12d   :  { %2578 = vmatmul.mubr.f32.vlgmr.msra.gmra.mrb[0].mxu1 %v3174_v48  ;;  %v475_v48 = vld [vmem:[%s3571_s4 + $0x10] sm:$0xff] }
 0x12e   :  { %2697 = vmatprep.mubr.msk.f32.mxu1 %vm2955_vm1, %v2956_v27 }
 0x200   :  { %v2579_v29 = vpop.f32.mrb[0].mxu1 }
 0x201   :  { %v468_v30 = vadd.f32 %v2579_v29, %v2258_v28  ;;  %v450_v31 = vpop.f32.mrb[1].mxu1 }
 0x202   :  { %v467_v32 = vadd.f32 %v2258_v28, %v450_v31 }
 0x203   :  { %v470_v33 = vmul.f32 0.2, %v468_v30 }
 0x204   :  { %v469_v34 = vmul.f32 0.2, %v467_v32 }
 0x205   :  { %v472_v35 = vmax.f32 %v468_v30, %v470_v33  ;;  %v2284_v33 = vld [vmem:[%s3574_s8 + $0x20] sm:$0xff] }
 0x206   :  { %v471_v36 = vmax.f32 %v467_v32, %v469_v34  ;;  %v2285_v34 = vld [vmem:[%s3574_s8 + $0x28] sm:$0xff] }
 0x207   :  { %v2883_v37 = vpack.c.bf16 %v2285_v34, %v2284_v33  ;;  %v2308_v33 = vld [vmem:[%s3580_s14 + $0x8] sm:$0xff] }
 0x208   :  { %v2844_v39 = vpack.c.bf16 %v472_v35, %v471_v36  ;;  %v824_v36 = vld [vmem:[%s3572_s7 + $0x8] sm:$0xf]  ;;  %s2962_s7 = smov 5  }
 0x20a   :  { %2845 = vmatpush3.bf16.msra.mxu0 %v2844_v39  ;;  %v2287_v39 = vld [vmem:[%s3574_s8 + $0x38] sm:$0xff] }
 0x20b   :  { %2846 = vmatprep.subr.bf16.mxu0 %v2954_v26 }
 0x20d   :  { %2585 = vmatmul.mubr.msk.f32.vlgmr.msra.gmra.mrb[6].mxu0 %vm477_vm2, %v473_v40  ;;  %v2886_v40 = vpack.c.bf16 %v2287_v39, %v2286_v38  ;;  %v1776_v39 = vld [vmem:[%s3581_s16] sm:$0xf] }
 0x20e   :  { %2587 = vmatprep.mubr.msk.f32.mxu0 %vm2955_vm1, %v2956_v27  ;;  %2848 = vmatpush3.bf16.msra.mxu0 %v2847_v41  ;;  %v908_v41 = vld [vmem:[%s3574_s8] sm:$0xff] }
 0x20f   :  { %2849 = vmatprep.subr.bf16.mxu0 %v2954_v26 }
 0x211   :  { %2588 = vmatmul.mubr.msk.f32.gmra.mrb[8].mxu0 %vm477_vm2, %v474_v44 }
 0x212   :  { %2590 = vmatprep.mubr.msk.f32.mxu0 %vm2955_vm1, %v2956_v27  ;;  %2851 = vmatpush3.bf16.msra.mxu0 %v2850_v45  ;;  %v2889_v45 = vpack.c.bf16 %v909_v42, %v908_v41 }
 0x213   :  { %2852 = vmatprep.subr.bf16.mxu0 %v2954_v26 }
 0x215   :  { %2591 = vmatmul.mubr.msk.f32.gmra.mrb[10].mxu0 %vm477_vm2, %v475_v48  ;;  %v911_v48 = vld [vmem:[%s3574_s8 + $0x18] sm:$0xff] }
 0x216   :  { %2854 = vmatpush3.bf16.msra.mxu0 %v2853_v49  ;;  %2609 = vmatprep.mubr.msk.f32.mxu0 %vm2955_vm1, %v2956_v27  ;;  %v2892_v49 = vpack.c.bf16 %v911_v48, %v910_v47 }
 0x217   :  { %2855 = vmatprep.subr.bf16.mxu0 %v2954_v26 }
 0x21a   :  { %2857 = vmatpush3.bf16.msra.mxu0 %v2856_v52  ;;  %v2895_v52 = vpack.c.bf16 %v2291_v51, %v2290_v50 }
 0x21b   :  { %2858 = vmatprep.subr.bf16.mxu0 %v2954_v26 }
 0x2e0   :  { %v553_v55 = vpop.f32.mrb[6].mxu0 }
 0x2e1   :  { %v2586_v56 = vpop.f32.mrb[7].mxu0 }
 0x2e4   :  { %v558_v60 = vpop.f32.mrb[8].mxu0 }
 0x2e5   :  { %2610 = vmatmul.mubr.msk.f32.vlgmr.msra.gmra.mrb[12].mxu0 %vm584_vm3, %v558_v60  ;;  %v2589_v61 = vpop.f32.mrb[9].mxu0 }
 0x2e6   :  { %2860 = vmatpush3.bf16.msra.mxu0 %v2859_v57  ;;  %2628 = vmatprep.mubr.msk.f32.mxu0 %vm2955_vm1, %v2956_v27  ;;  %v2295_v61 = vld [vmem:[%s3575_s9] ss:$0 sm:$0xff]  ;;  %s2959_s9 = smov 2  }
 0x2e7   :  { %2861 = vmatprep.subr.bf16.mxu0 %v2954_v26 }
 0x2e8   :  { %v563_v1 = vpop.f32.mrb[10].mxu0 }
 0x2e9   :  { %v2592_v2 = vpop.f32.mrb[11].mxu0 }
 0x2ea   :  { %2863 = vmatpush3.bf16.msra.mxu0 %v2862_v62 }
 0x2eb   :  { %2864 = vmatprep.subr.bf16.mxu0 %v2954_v26 }
 0x2ee   :  { %2866 = vmatpush3.bf16.msra.mxu0 %v2865_v3 }
 0x2ef   :  { %2867 = vmatprep.subr.bf16.mxu0 %v2954_v26 }
 0x2f2   :  { %2869 = vmatpush3.bf16.msra.mxu0 %v2868_v6  ;;  %v1232_v6 = vld [vmem:[%s3577_s11 + $0x8] sm:$0xff] }
 0x2f3   :  { %2870 = vmatprep.subr.bf16.mxu0 %v2954_v26  ;;  %v2904_v7 = vpack.c.bf16 %v1232_v6, %v1231_v5  ;;  %v2964_v5 = vmov 683565275  }
 0x2f5   :  { %2629 = vmatmul.mubr.msk.f32.vlgmr.msra.gmra.mrb[14].mxu0 %vm584_vm3, %v553_v55  ;;  %v2898_v55 = vpack.c.bf16 %v2293_v54, %v2292_v53  ;;  %v1777_v53 = vld [vmem:[%s3583_s17] sm:$0x1]  ;;  %s2961_s17 = smov 1  }
 0x2f6   :  { %2872 = vmatpush3.bf16.msra.mxu0 %v2871_v9  ;;  %2647 = vmatprep.mubr.msk.f32.mxu0 %vm2955_vm1, %v2956_v27  ;;  %v2299_v9 = vld [vmem:[%s3577_s11 + $0x18] sm:$0xff] }
 0x2f7   :  { %2873 = vmatprep.subr.bf16.mxu0 %v2954_v26  ;;  %v2901_v10 = vpack.c.bf16 %v2299_v9, %v2298_v8 }
 0x2f9   :  { %2902 = vmatpush3.bf16.msra.mxu1 %v2901_v10  ;;  %v2966_v10 = vmov 2131351028  }
 0x2fa   :  { %2875 = vmatpush3.bf16.msra.mxu0 %v2874_v12  ;;  %2906 = vmatprep.subr.bf16.mxu1 %v2954_v26  ;;  %v2303_v12 = vld [vmem:[%s3577_s11 + $0x28] sm:$0xff] }
 0x2fb   :  { %2876 = vmatprep.subr.bf16.mxu0 %v2954_v26  ;;  %v2907_v14 = vpack.c.bf16 %v2303_v12, %v2302_v11 }
 0x2fe   :  { %2878 = vmatpush3.bf16.msra.mxu0 %v2877_v15 }
 0x2ff   :  { %2879 = vmatprep.subr.bf16.mxu0 %v2954_v26 }
 0x302   :  { %2881 = vmatpush3.bf16.msra.mxu0 %v2880_v18 }
 0x305   :  { %2648 = vmatmul.mubr.msk.f32.vlgmr.msra.gmra.mrb[16].mxu0 %vm584_vm3, %v563_v1 }
 0x306   :  { %2652 = vmatprep.mubr.msk.f32.mxu0 %vm826_vm4, %v823_v19 }
 0x3b8   :  { %v654_v20 = vpop.f32.mrb[12].mxu0 }
 0x3b9   :  { %v2611_v21 = vpop.f32.mrb[13].mxu0 }
 0x3c8   :  { %v727_v22 = vpop.f32.mrb[14].mxu0 }
 0x3c9   :  { %v728_v23 = vadd.f32 %v727_v22, %v654_v20  ;;  %v2630_v24 = vpop.f32.mrb[15].mxu0  ;;  %v2305_v22 = vld [vmem:[%s3578_s12] ss:$0 sm:$0xff] }
 0x3d8   :  { %v809_v28 = vpop.f32.mrb[16].mxu0 }
 0x3d9   :  { %v813_v29 = vadd.f32 %v809_v28, %v728_v23  ;;  %v2649_v30 = vpop.f32.mrb[17].mxu0 }
 0x3db   :  { %v820_v31 = vadd.f32 %v2281_v25, %v813_v29 }
 0x3dd   :  { %v821_v32 = vmul.f32 0.2, %v820_v31 }
 0x3df   :  { %v822_v35 = vmax.f32 %v820_v31, %v821_v32  ;;  %v1468_v31 = vld [vmem:[%s3579_s13] sm:$0x7] }
 0x3e0   :  { %v1548_v32 = vld [vmem:[%s3580_s14] sm:$0xff] }
 0x3e1   :  { %2650 = vmatprep.subr.mxu0 %v822_v35 }
 0x3e2   :  { %2651 = vmatpush3.msra.mxu0 %v822_v35 }
 0x3e3   :  { %2653 = vmatmul.mubr.msk.f32.vlgmr.msra.gmra.mrb[18].mxu0 %vm826_vm4, %v824_v36  ;;  %2882 = vmatprep.subr.bf16.mxu0 %v2954_v26  ;;  %v2311_v36 = vld [vmem:[%s3580_s14 + $0x10] sm:$0xff] }
 0x3e4   :  { %2884 = vmatpush3.bf16.msra.mxu0 %v2883_v37  ;;  %2663 = vmatprep.mubr.msk.f32.mxu0 %vm2955_vm1, %v2956_v27 }
 0x3e5   :  { %2885 = vmatprep.subr.bf16.mxu0 %v2954_v26 }
 0x3e8   :  { %2887 = vmatpush3.bf16.msra.mxu0 %v2886_v40 }
 0x3e9   :  { %2888 = vmatprep.subr.bf16.mxu0 %v2954_v26 }
 0x4b6   :  { %v2654_v43 = vpop.f32.mrb[18].mxu0 }
 0x4b7   :  { %v899_v44 = vpop.f32.mrb[19].mxu0 }
 0x4b8   :  { %v918_v46 = vrot.slane %v899_v44, 4 }
 0x4ba   :  { %2664 = vmatmul.mubr.msk.f32.vlgmr.msra.gmra.mrb[20].mxu0 %vm70_vm0, %v918_v46 }
 0x4bb   :  { %2890 = vmatpush3.bf16.msra.mxu0 %v2889_v45  ;;  %2674 = vmatprep.mubr.msk.f32.mxu0 %vm2955_vm1, %v2956_v27  ;;  %v1469_v45 = vld [vmem:[%s3582_s15] sm:$0x1]  ;;  %s2958_s15 = smov 127  }
 0x4bc   :  { %2891 = vmatprep.subr.bf16.mxu0 %v2954_v26 }
 0x4bf   :  { %2893 = vmatpush3.bf16.msra.mxu0 %v2892_v49 }
 0x4c0   :  { %2894 = vmatprep.subr.bf16.mxu0 %v2954_v26 }
 0x4c2   :  { %2675 = vmatmul.mubr.msk.f32.vlgmr.msra.gmra.mrb[22].mxu0 %vm70_vm0, %v899_v44 }
 0x4c3   :  { %2896 = vmatpush3.bf16.msra.mxu0 %v2895_v52  ;;  %2685 = vmatprep.mubr.msk.f32.mxu0 %vm2955_vm1, %v2956_v27  ;;  %v2957_v52 = vmov 4  }
 0x4c4   :  { %2897 = vmatprep.subr.bf16.mxu0 %v2954_v26  ;;  %2941 = vset.pattern.permute.xlu1 %v2957_v52 }
 0x4c5   :  { %2940 = vset.pattern.permute.xlu0 %v2957_v52 }
 0x4c7   :  { %2899 = vmatpush3.bf16.msra.mxu0 %v2898_v55 }
 0x4c8   :  { %2688 = vmatprep.subr.mxu0 %v2956_v27 }
 0x4ca   :  { %2686 = vmatmul.mubr.msk.f32.vlgmr.msra.gmra.mrb[24].mxu0 %vm70_vm0, %v2654_v43 }
 0x4cb   :  { %2690 = vmatprep.mubr.msk.f32.mxu0 %vm2955_vm1, %v2956_v27 }
 0x58d   :  { %v987_v56 = vpop.f32.mrb[20].mxu0 }
 0x58e   :  { %v2665_v57 = vpop.f32.mrb[21].mxu0 }
 0x595   :  { %v1059_v58 = vpop.f32.mrb[22].mxu0 }
 0x596   :  { %v1060_v59 = vadd.f32 %v1059_v58, %v987_v56  ;;  %v2676_v60 = vpop.f32.mrb[23].mxu0 }
 0x59d   :  { %v1137_v62 = vpop.f32.mrb[24].mxu0 }
 0x59e   :  { %v1141_v63 = vadd.f32 %v1137_v62, %v1060_v59  ;;  %v2687_v0 = vpop.f32.mrb[25].mxu0 }
 0x5a0   :  { %v1148_v1 = vadd.f32 %v2295_v61, %v1141_v63 }
 0x5a2   :  { %v1149_v2 = vmul.f32 0.2, %v1148_v1 }
 0x5a4   :  { %v1150_v3 = vmax.f32 %v1148_v1, %v1149_v2 }
 0x5a6   :  { %2689 = vmatpush3.msk.msra.mxu0 %vm1157_vm5, %v1150_v3 }
 0x5a7   :  { %2691 = vmatmul.mubr.msk.f32.vlgmr.msra.gmra.mrb[26].mxu0 %vm1153_vm6, %v1151_v4  ;;  %2903 = vmatprep.subr.bf16.mxu0 %v2954_v26 }
 0x5a8   :  { %2704 = vmatprep.mubr.msk.f32.mxu0 %vm2955_vm1, %v2956_v27  ;;  %2905 = vmatpush3.bf16.msra.mxu0 %v2904_v7  ;;  %v2965_v7 = vmov 2475754826  }
 0x5a9   :  { %2714 = vmatprep.subr.mxu0 %v2956_v27 }
 0x67a   :  { %v1227_v13 = vpop.f32.mrb[26].mxu0 }
 0x67b   :  { %v1237_v15 = vrot.slane %v1227_v13, 2  ;;  %2705 = vmatmul.mubr.msk.f32.vlgmr.msra.gmra.mrb[28].mxu0 %vm477_vm2, %v1227_v13  ;;  %v2692_v16 = vpop.f32.mrb[27].mxu0  ;;  %v1385_v26 = vrot.slane %v1227_v13, 4  ;;  %v2967_v13 = vmov 2102212464  }
 0x67c   :  { %2716 = vmatprep.mubr.msk.f32.mxu0 %vm2955_vm1, %v2956_v27  ;;  %v2968_v16 = vmov 920167782  }
 0x67d   :  { %2698 = vmatmul.mubr.msk.f32.vlgmr.msra.gmra.mrb[2].mxu1 %vm477_vm2, %v1237_v15 }
 0x67e   :  { %2908 = vmatpush3.bf16.msra.mxu1 %v2907_v14  ;;  %2711 = vmatprep.mubr.msk.f32.mxu1 %vm2955_vm1, %v2956_v27 }
 0x67f   :  { %2719 = vmatprep.subr.mxu1 %v2956_v27 }
 0x681   :  { %2712 = vmatmul.mubr.msk.f32.vlgmr.msra.gmra.mrb[4].mxu1 %vm477_vm2, %v1385_v26 }
 0x682   :  { %2721 = vmatprep.mubr.msk.f32.mxu1 %vm2955_vm1, %v2956_v27  ;;  %2720 = vmatpush3.msra.mxu1 %v2308_v33 }
 0x683   :  { %2729 = vmatprep.subr.mxu1 %v2956_v27 }
 0x74e   :  { %v1378_v17 = vpop.f32.mrb[28].mxu0 }
 0x74f   :  { %v2706_v18 = vpop.f32.mrb[29].mxu0 }
 0x750   :  { %v1306_v19 = vpop.f32.mrb[2].mxu1  ;;  %v2969_v18 = vmov 1326507024  }
 0x751   :  { %v1379_v20 = vadd.f32 %v1378_v17, %v1306_v19  ;;  %v2699_v21 = vpop.f32.mrb[3].mxu1 }
 0x754   :  { %v1454_v23 = vpop.f32.mrb[4].mxu1 }
 0x755   :  { %v1458_v24 = vadd.f32 %v1454_v23, %v1379_v20  ;;  %v2713_v25 = vpop.f32.mrb[5].mxu1 }
 0x757   :  { %v1465_v28 = vadd.f32 %v2305_v22, %v1458_v24 }
 0x759   :  { %v1466_v29 = vmul.f32 0.2, %v1465_v28 }
 0x75b   :  { %v1467_v30 = vmax.f32 %v1465_v28, %v1466_v29 }
 0x75d   :  { %2715 = vmatpush3.msk.msra.mxu0 %vm1474_vm7, %v1467_v30 }
 0x75e   :  { %2717 = vmatmul.mubr.msk.f32.vlgmr.msra.gmra.mrb[30].mxu0 %vm1470_vm8, %v1468_v31  ;;  %2724 = vmatprep.subr.mxu0 %v2956_v27 }
 0x75f   :  { %2726 = vmatprep.mubr.msk.f32.mxu0 %vm2955_vm1, %v2956_v27  ;;  %2725 = vmatpush3.msra.mxu0 %v1548_v32 }
 0x760   :  { %2734 = vmatprep.subr.mxu0 %v2956_v27 }
 0x831   :  { %v1544_v34 = vpop.f32.mrb[30].mxu0 }
 0x832   :  { %v1552_v35 = vrot.slane %v1544_v34, 1  ;;  %2727 = vmatmul.mubr.msk.f32.vlgmr.msra.gmra.mrb[32].mxu0 %vm826_vm4, %v1544_v34  ;;  %v2718_v37 = vpop.f32.mrb[31].mxu0  ;;  %v1699_v38 = vrot.slane %v1544_v34, 2 }
 0x833   :  { %2736 = vmatprep.mubr.msk.f32.mxu0 %vm2955_vm1, %v2956_v27  ;;  %2735 = vmatpush3.msk.msra.mxu0 %vm1157_vm5, %v1776_v39 }
 0x834   :  { %2722 = vmatmul.mubr.msk.f32.vlgmr.msra.gmra.mrb[6].mxu1 %vm826_vm4, %v1552_v35 }
 0x835   :  { %2730 = vmatpush3.msra.mxu1 %v2311_v36  ;;  %2731 = vmatprep.mubr.msk.f32.mxu1 %vm2955_vm1, %v2956_v27 }
 0x838   :  { %2732 = vmatmul.mubr.msk.f32.vlgmr.msra.gmra.mrb[8].mxu1 %vm826_vm4, %v1699_v38 }
 0x905   :  { %v1693_v40 = vpop.f32.mrb[32].mxu0 }
 0x906   :  { %v2728_v41 = vpop.f32.mrb[33].mxu0 }
 0x907   :  { %v1621_v42 = vpop.f32.mrb[6].mxu1 }
 0x908   :  { %v1694_v43 = vadd.f32 %v1693_v40, %v1621_v42  ;;  %v2723_v44 = vpop.f32.mrb[7].mxu1 }
 0x90b   :  { %v1768_v46 = vpop.f32.mrb[8].mxu1 }
 0x90c   :  { %v1772_v47 = vadd.f32 %v1768_v46, %v1694_v43  ;;  %v2733_v48 = vpop.f32.mrb[9].mxu1 }
 0x90e   :  { %v1773_v49 = vadd.f32 %v1772_v47, %v1469_v45 }
 0x910   :  { %v1774_v50 = vmul.f32 0.2, %v1773_v49 }
 0x912   :  { %v1775_v51 = vmax.f32 %v1773_v49, %v1774_v50 }
 0x914   :  { %2737 = vmatmul.mubr.msk.f32.vlgmr.msra.gmra.mrb[34].mxu0 %vm1153_vm6, %v1775_v51 }
 0x9e7   :  { %v1850_v54 = vpop.f32.mrb[34].mxu0 }
 0x9e8   :  { %v3519_v55 = vadd.f32 %v1850_v54, %v1777_v53  ;;  %v2738_v56 = vpop.f32.mrb[35].mxu0 }
 0x9ea   :  { %2948 = vtanh.f32 %v3519_v55  ;;  %2077 = vrot.lane.b32.xlu1 %v3519_v55, %s2958_s15  ;;  %2066 = vrot.lane.b32.xlu0 %v3519_v55, %s2959_s9  ;;  %v3526_v57 = vmul.f32 0.017453292, %v3519_v55 }
 0x9ec   :  { %v1861_v58 = vand.u32 2139095040, %v3526_v57  ;;  %v1858_v63 = vand.u32 2147483647, %v3526_v57  ;;  %vm1860_vm0 = vcmp.lt.s32.totalorder %v3526_v57, 0  ;;  %vm1950_vm8 = vweird.f32 %v3526_v57 }
 0x9ee   :  { %2081 = vrot.lane.b32.xlu1 %v3519_v55, %s2960_s26  ;;  %2071 = vrot.lane.b32.xlu0 %v3519_v55, %s2961_s17  ;;  %v1862_v59 = vshrl.u32 %v1861_v58, 23  ;;  %v1865_v2 = vand.u32 8388607, %v1858_v63  ;;  %vm1859_vm1 = vcmp.le.f32.partialorder %v1858_v63, 0.7853982 }
 0x9f0   :  { %v2315_v60 = vadd.s32 4294967169, %v1862_v59  ;;  %v1866_v20 = vor.u32 8388608, %v1865_v2 }
 0x9f2   :  { %v1868_v61 = vadd.s32 1, %v2315_v60  ;;  %v1906_v36 = vshll.u32 %v1866_v20, 8 }
 0x9f4   :  { %v3532_v62 = vpop.eup %2948  ;;  %vm1869_vm9 = vcmp.gt.s32.totalorder %v1868_v61, 0 }
 0x9f5   :  { %2100 = vrot.lane.b32.xlu1 %v3532_v62, %s2962_s7  ;;  %v1870_v0 = vsel %vm1869_vm9, %v1868_v61, 0 }
 0x9f6   :  { %v1872_v1 = vand.u32 31, %v1870_v0  ;;  %v1871_v4 = vshrl.u32 %v1870_v0, 5 }
 0x9f8   :  { %v1873_v3 = vsub.s32 32, %v1872_v1  ;;  %v1875_v6 = vshll.u32 %v2964_v5, %v1872_v1  ;;  %v1878_v8 = vshll.u32 %v2965_v7, %v1872_v1  ;;  %v1881_v12 = vshll.u32 %v2966_v10, %v1872_v1 }
 0x9f9   :  { %2104 = vrot.lane.b32.xlu1 %v3532_v62, %s2963_s23  ;;  %v1884_v15 = vshll.u32 %v2967_v13, %v1872_v1  ;;  %v1887_v17 = vshll.u32 %v2968_v16, %v1872_v1  ;;  %vm1890_vm10 = vcmp.lt.s32.totalorder %v1871_v4, 1  ;;  %vm1893_vm11 = vcmp.lt.s32.totalorder %v1871_v4, 4 }
 0x9fa   :  { %v1876_v9 = vshrl.u32 %v2965_v7, %v1873_v3  ;;  %v1879_v11 = vshrl.u32 %v2966_v10, %v1873_v3  ;;  %v1882_v14 = vshrl.u32 %v2967_v13, %v1873_v3  ;;  %v1885_v26 = vshrl.u32 %v2968_v16, %v1873_v3 }
 0x9fb   :  { %v1888_v19 = vshrl.u32 %v2969_v18, %v1873_v3  ;;  %v1874_v31 = vshrl.u32 %v2964_v5, %v1873_v3  ;;  %vm1892_vm12 = vcmp.lt.s32.totalorder %v1871_v4, 3  ;;  %vm1891_vm13 = vcmp.lt.s32.totalorder %v1871_v4, 2 }
 0x9fc   :  { %v1877_v21 = vor.u32 %v1876_v9, %v1875_v6  ;;  %v1880_v22 = vor.u32 %v1879_v11, %v1878_v8  ;;  %v1883_v23 = vor.u32 %v1882_v14, %v1881_v12  ;;  %v1886_v24 = vor.u32 %v1885_v26, %v1884_v15 }
 0x9fd   :  { %2163 = vrot.lane.b32.xlu1 %v3532_v62, %s2970_s10  ;;  %v1889_v25 = vor.u32 %v1888_v19, %v1887_v17 }
 0x9fe   :  { %v1895_v28 = vsel %vm1893_vm11, %v1883_v23, 2102212464  ;;  %v1898_v29 = vsel %vm1890_vm10, %v1877_v21, %v1880_v22  ;;  %v1902_v30 = vsel %vm1890_vm10, %v1880_v22, %v1883_v23  ;;  %v1899_v32 = vsel %vm1893_vm11, %v1886_v24, 920167782 }
 0x9ff   :  { %v1903_v33 = vsel %vm1893_vm11, %v1889_v25, 1326507024  ;;  %v1900_v34 = vsel %vm1892_vm12, %v1883_v23, %v1899_v32  ;;  %v1894_v37 = vsel %vm1890_vm10, %v1874_v31, %v1877_v21  ;;  %v1896_v38 = vsel %vm1892_vm12, %v1880_v22, %v1895_v28 }
 0xa00   :  { %v1904_v35 = vsel %vm1892_vm12, %v1886_v24, %v1903_v33  ;;  %v1901_v39 = vsel %vm1891_vm13, %v1898_v29, %v1900_v34  ;;  %v1897_v45 = vsel %vm1891_vm13, %v1894_v37, %v1896_v38 }
 0xa01   :  { %v1905_v40 = vsel %vm1891_vm13, %v1902_v30, %v1904_v35  ;;  %v3543_v43 = vmul.u32.u64.low %v1906_v36, %v1901_v39  ;;  %v3544_v44 = vmul.u32.u64.high %v1906_v36, %v1901_v39, %v3543_v43  ;;  %v1913_v47 = vmul.u32 %v1906_v36, %v1897_v45 }
 0xa02   :  { %v3540_v41 = vmul.u32.u64.low %v1906_v36, %v1905_v40  ;;  %v3541_v42 = vmul.u32.u64.high %v1906_v36, %v1905_v40, %v3540_v41 }
 0xa03   :  { %v1916_v46 = vadd.s32 1, %v3544_v44 }
 0xa04   :  { %vm1915_vm14 = vc.u32 %v3541_v42, %v3543_v43  ;;  %v1914_v3 = vadd.s32 %v3543_v43, %v3541_v42 }
 0xa05   :  { %v1917_v48 = vsel %vm1915_vm14, %v1916_v46, %v3544_v44  ;;  %v2971_v46 = vmov 5  }
 0xa06   :  { %v1918_v49 = vadd.s32 %v1917_v48, %v1913_v47  ;;  %v2973_v48 = vmov 6  }
 0xa08   :  { %v1919_v50 = vadd.s32 536870912, %v1918_v49 }
 0xa0a   :  { %v1920_v51 = vshrl.u32 %v1919_v50, 30 }
 0xa0c   :  { %v1921_v53 = vshll.u32 %v1920_v51, 30  ;;  %v1944_v15 = vsub.s32 4, %v1920_v51 }
 0xa0e   :  { %v1922_v54 = vsub.s32 %v1918_v49, %v1921_v53  ;;  %v1945_v16 = vsel %vm1860_vm0, %v1944_v15, %v1920_v51 }
 0xa0f   :  { %v1947_v26 = vsel %vm1859_vm1, 0, %v1945_v16 }
 0xa10   :  { %v1924_v56 = vsub.s32 0, %v1922_v54  ;;  %v2054_v17 = vadd.s32 3, %v1947_v26  ;;  %v1951_v23 = vand.u32 3, %v1947_v26 }
 0xa12   :  { %v2316_v58 = vmin.u32 %v1924_v56, %v1922_v54  ;;  %v2055_v20 = vand.u32 3, %v2054_v17  ;;  %vm1953_vm4 = vcmp.eq.s32.totalorder %v1951_v23, 0  ;;  %vm1956_vm5 = vcmp.eq.s32.totalorder %v1951_v23, 2 }
 0xa13   :  { %vm1952_vm7 = vcmp.lt.s32.totalorder %v1951_v23, 2 }
 0xa14   :  { %v1926_v59 = vclz %v2316_v58  ;;  %vm2057_vm2 = vcmp.eq.s32.totalorder %v2055_v20, 0  ;;  %vm2060_vm3 = vcmp.eq.s32.totalorder %v2055_v20, 2  ;;  %vm2056_vm6 = vcmp.lt.s32.totalorder %v2055_v20, 2 }
 0xa16   :  { %v2317_v60 = vadd.s32 4294967294, %v1926_v59 }
 0xa18   :  { %vm2318_vm15 = vcmp.lt.s32.totalorder %v2317_v60, 0 }
 0xa19   :  { %v1929_v61 = vsel %vm2318_vm15, 0, %v2317_v60 }
 0xa1a   :  { %v1934_v0 = vsub.s32 4294967266, %v1929_v61  ;;  %v1930_v2 = vsub.s32 32, %v1929_v61  ;;  %v1931_v6 = vshll.u32 %v1922_v54, %v1929_v61  ;;  %v2974_v61 = vmov 14  }
 0xa1c   :  { %v1935_v1 = vadd.s32 127, %v1934_v0  ;;  %v1932_v5 = vshrl.u32 %v1914_v3, %v1930_v2  ;;  %v2975_v0 = vmov 13   ;;  %v2976_v3 = vmov 15  }
 0xa1e   :  { %v1936_v4 = vshll.u32 %v1935_v1, 23  ;;  %v1933_v8 = vor.u32 %v1932_v5, %v1931_v6 }
 0xa20   :  { %v1937_v7 = vor.u32 4788187, %v1936_v4  ;;  %v1940_v10 = vcvt.s32.f32 %v1933_v8 }
 0xa22   :  { %v1938_v9 = vand.u32 2147483647, %v1937_v7 }
 0xa24   :  { %v1941_v11 = vmul.f32 %v1940_v10, %v1938_v9 }
 0xa26   :  { %v1942_v12 = vxor.u32 2147483648, %v1941_v11 }
 0xa28   :  { %v1943_v13 = vsel %vm1860_vm0, %v1942_v12, %v1941_v11 }
 0xa29   :  { %v1946_v14 = vsel %vm1859_vm1, %v3526_v57, %v1943_v13 }
 0xa2a   :  { %2950 = vcosq.f32 %v1946_v14 }
 0xa2b   :  { %2952 = vsinq.f32 %v1946_v14 }
 0xa34   :  { %v2951_v18 = vpop.eup %2950 }
 0xa35   :  { %v2953_v19 = vpop.eup %2952  ;;  %v1957_v22 = vxor.u32 2147483648, %v2951_v18 }
 0xa36   :  { %v1954_v21 = vxor.u32 2147483648, %v2953_v19 }
 0xa37   :  { %v2062_v25 = vsel %vm2060_vm3, %v1957_v22, %v2953_v19  ;;  %v1958_v28 = vsel %vm1956_vm5, %v1957_v22, %v2953_v19 }
 0xa38   :  { %v2059_v24 = vsel %vm2057_vm2, %v2951_v18, %v1954_v21  ;;  %v1955_v63 = vsel %vm1953_vm4, %v2951_v18, %v1954_v21 }
 0xa39   :  { %v2063_v29 = vsel %vm2056_vm6, %v2059_v24, %v2062_v25  ;;  %v1959_v30 = vsel %vm1952_vm7, %v1955_v63, %v1958_v28  ;;  %vm2214_vm7 = vcmask 139264  }
 0xa3a   :  { %v2064_v33 = vsel %vm1950_vm8, nan, %v2063_v29  ;;  %v1960_v34 = vsel %vm1950_vm8, nan, %v1959_v30 }
 0xa3b   :  { %v2070_v36 = vsub.f32 0.0, %v2064_v33 }
 0xa5c   :  { %v2078_v31 = vpop.permute.xlu1 %2077  ;;  %v2067_v32 = vpop.permute.xlu0 %2066 }
 0xa5d   :  { %v2069_v35 = vmul.f32 %v2067_v32, %v1960_v34  ;;  %v2075_v41 = vmul.f32 %v2067_v32, %v2064_v33 }
 0xa5f   :  { %v2080_v42 = vmul.f32 %v2078_v31, %v2069_v35  ;;  %v2091_v57 = vmul.f32 %v2078_v31, %v2075_v41 }
 0xa60   :  { %v2072_v37 = vpop.permute.xlu0 %2071  ;;  %v2082_v40 = vpop.permute.xlu1 %2081 }
 0xa61   :  { %v2074_v38 = vmul.f32 %v2072_v37, %v2070_v36  ;;  %v2076_v39 = vmul.f32 %v2072_v37, %v1960_v34 }
 0xa63   :  { %2119 = vperm.xlu1 %2941, %v2074_v38   ;;  %v2084_v43 = vmul.f32 %v2082_v40, %v2074_v38  ;;  %v2092_v45 = vmul.f32 %v2082_v40, %v2076_v39 }
 0xa65   :  { %v2085_v44 = vadd.f32 %v2084_v43, %v2080_v42  ;;  %v2093_v47 = vadd.f32 %v2092_v45, %v2091_v57 }
 0xa67   :  { %2087 = vrot.lane.b32.xlu0 %v2085_v44, %s2961_s17  ;;  %2942 = vset.pattern.permute.xlu1 %v2971_v46  ;;  %v2101_v49 = vpop.permute.xlu1 %2100 }
 0xa6b   :  { %2095 = vrot.lane.b32.xlu0 %v2093_v47, %s2959_s9  ;;  %v2105_v58 = vpop.permute.xlu1 %2104 }
 0xa6f   :  { %2159 = vrot.lane.b32.xlu0 %v3532_v62, %s2972_s21  ;;  %v2164_v1 = vpop.permute.xlu1 %2163 }
 0xa73   :  { %2111 = vperm.xlu0 %2940, %v2069_v35  }
 0xa77   :  { %2135 = vperm.xlu0 %2940, %v2075_v41  }
 0xa7b   :  { %2945 = vset.pattern.permute.xlu0 %v2973_v48 }
 0xad9   :  { %v2088_v50 = vpop.permute.xlu0 %2087 }
 0xada   :  { %v2090_v51 = vsub.f32 %v3519_v55, %v2088_v50 }
 0xadc   :  { %v2103_v53 = vadd.f32 %v2101_v49, %v2090_v51 }
 0xadd   :  { %v2096_v54 = vpop.permute.xlu0 %2095 }
 0xade   :  { %v2098_v56 = vsub.f32 %v3519_v55, %v2096_v54  ;;  %2127 = vperm.xlu1 %2942, %v2103_v53   ;;  %v1855_v55 = vlaneseq }
 0xae0   :  { %v2107_v59 = vadd.f32 %v2105_v58, %v2098_v56  ;;  %v2166_v2 = vadd.f32 %v2164_v1, %v2098_v56  ;;  %v1856_v4 = vand.u32 127, %v1855_v55 }
 0xae1   :  { %v2160_v60 = vpop.permute.xlu0 %2159 }
 0xae2   :  { %2943 = vset.pattern.permute.xlu1 %v2957_v52  ;;  %2151 = vperm.xlu0 %2945, %v2107_v59   ;;  %v2162_v62 = vadd.f32 %v2160_v60, %v2090_v51  ;;  %vm2108_vm9 = vcmp.eq.s32.totalorder %v1856_v4, 0  ;;  %vm2116_vm10 = vcmp.eq.s32.totalorder %v1856_v4, 1  ;;  %v2120_v5 = vpop.permute.xlu1 %2119  ;;  %vm2124_vm11 = vcmp.eq.s32.totalorder %v1856_v4, 2 }
 0xae3   :  { %2143 = vperm.xlu1 %2943, %v2076_v39   ;;  %v2122_v7 = vsel %vm2116_vm10, %v2120_v5, 0.0  ;;  %vm2132_vm12 = vcmp.eq.s32.totalorder %v1856_v4, 3  ;;  %vm2140_vm13 = vcmp.eq.s32.totalorder %v1856_v4, 4  ;;  %vm2148_vm14 = vcmp.eq.s32.totalorder %v1856_v4, 5 }
 0xae4   :  { %vm2156_vm15 = vcmp.eq.s32.totalorder %v1856_v4, 8  ;;  %vm2167_vm0 = vcmp.eq.s32.totalorder %v1856_v4, 9  ;;  %vm2174_vm1 = vcmp.eq.s32.totalorder %v1856_v4, 10  ;;  %vm2181_vm2 = vcmp.eq.s32.totalorder %v1856_v4, 11 }
 0xae5   :  { %v2157_v19 = vsel %vm2156_vm15, 1.0, %v2956_v27  ;;  %vm2189_vm3 = vcmp.eq.s32.totalorder %v1856_v4, 12  ;;  %vm2196_vm4 = vcmp.eq.s32.totalorder %v1856_v4, 13  ;;  %vm2203_vm5 = vcmp.eq.s32.totalorder %v1856_v4, 14 }
 0xae6   :  { %2946 = vset.pattern.permute.xlu0 %v2974_v61  ;;  %vm2211_vm6 = vcmp.eq.s32.totalorder %v1856_v4, 17 }
 0xae7   :  { %2944 = vset.pattern.permute.xlu1 %v2975_v0  ;;  %2184 = vperm.xlu0 %2946, %v2162_v62   ;;  %v2212_v40 = vsel %vm2211_vm6, 1.0, %v2956_v27 }
 0xae8   :  { %2169 = vperm.xlu1 %2944, %v2069_v35  }
 0xaeb   :  { %2947 = vset.pattern.permute.xlu0 %v2976_v3 }
 0xaec   :  { %2176 = vperm.xlu1 %2944, %v2074_v38   ;;  %2206 = vperm.xlu0 %2947, %v2166_v2  }
 0xaf0   :  { %2191 = vperm.xlu1 %2944, %v2075_v41  }
 0xaf2   :  { %v2112_v52 = vpop.permute.xlu0 %2111 }
 0xaf3   :  { %v2114_v6 = vsel %vm2108_vm9, %v2112_v52, 0.0 }
 0xaf4   :  { %2198 = vperm.xlu1 %2944, %v2076_v39   ;;  %v2123_v8 = vadd.f32 %v2122_v7, %v2114_v6 }
 0xaf6   :  { %v2136_v9 = vpop.permute.xlu0 %2135 }
 0xaf7   :  { %v2138_v13 = vsel %vm2132_vm12, %v2136_v9, 0.0 }
 0xb5d   :  { %v2128_v10 = vpop.permute.xlu1 %2127 }
 0xb5e   :  { %v2130_v11 = vsel %vm2124_vm11, %v2128_v10, 0.0 }
 0xb5f   :  { %v2131_v12 = vadd.f32 %v2130_v11, %v2123_v8 }
 0xb61   :  { %v2139_v14 = vadd.f32 %v2138_v13, %v2131_v12  ;;  %v2152_v15 = vpop.permute.xlu0 %2151 }
 0xb62   :  { %v2144_v16 = vpop.permute.xlu1 %2143  ;;  %v2154_v18 = vsel %vm2148_vm14, %v2152_v15, 0.0 }
 0xb63   :  { %v2146_v26 = vsel %vm2140_vm13, %v2144_v16, 0.0 }
 0xb64   :  { %v2147_v17 = vadd.f32 %v2146_v26, %v2139_v14 }
 0xb66   :  { %v2155_v20 = vadd.f32 %v2154_v18, %v2147_v17  ;;  %v2185_v25 = vpop.permute.xlu0 %2184 }
 0xb67   :  { %v2170_v21 = vpop.permute.xlu1 %2169  ;;  %v2187_v30 = vsel %vm2181_vm2, %v2185_v25, 0.0 }
 0xb68   :  { %v2158_v22 = vadd.f32 %v2157_v19, %v2155_v20  ;;  %v2172_v23 = vsel %vm2167_vm0, %v2170_v21, 0.0 }
 0xb6a   :  { %v2173_v24 = vadd.f32 %v2172_v23, %v2158_v22 }
 0xb6b   :  { %v2177_v63 = vpop.permute.xlu1 %2176  ;;  %v2207_v34 = vpop.permute.xlu0 %2206 }
 0xb6c   :  { %v2179_v28 = vsel %vm2174_vm1, %v2177_v63, 0.0  ;;  %v2209_v39 = vsel %vm2203_vm5, %v2207_v34, 0.0 }
 0xb6d   :  { %v2180_v29 = vadd.f32 %v2179_v28, %v2173_v24 }
 0xb6f   :  { %v2188_v31 = vadd.f32 %v2187_v30, %v2180_v29  ;;  %v2192_v32 = vpop.permute.xlu1 %2191 }
 0xb70   :  { %v2194_v33 = vsel %vm2189_vm3, %v2192_v32, 0.0 }
 0xb71   :  { %v2195_v35 = vadd.f32 %v2194_v33, %v2188_v31 }
 0xb73   :  { %v2199_v36 = vpop.permute.xlu1 %2198 }
 0xb74   :  { %v2201_v37 = vsel %vm2196_vm4, %v2199_v36, 0.0 }
 0xb75   :  { %v2202_v38 = vadd.f32 %v2201_v37, %v2195_v35 }
 0xb77   :  { %v2210_v41 = vadd.f32 %v2209_v39, %v2202_v38 }
 0xb79   :  { %v2213_v42 = vadd.f32 %v2212_v40, %v2210_v41 }
 0xb7b   :  { %2215 = vst.msk [vmem:[%s3584_s18] sm:$0x1] %vm2214_vm7, %v2213_v42 }

</bundles_post_ra>
